<compile_context>
chip_gen: v7x
topology: tpu7x:2x2x1
jax: 0.10.0
libtpu: 0.0.40
codegen_flags: <defaults>
</compile_context>

<pallas_src>
import math
import functools

import jax
import jax.numpy as jnp
from jax.experimental import pallas as pl
from jax.experimental.pallas import tpu as pltpu

# ----------------------------- model config -----------------------------
BATCH = 2
SEQ = 8
D_MODEL = 32
N_HEADS = 4
DIM_FF = 64
N_LAYERS = 2
LN_EPS = 1e-5


# ----------------------------- fused Pallas kernel -----------------------------
def _fused_encoder_kernel(
    x_ref,
    wq_ref, bq_ref, wk_ref, bk_ref, wv_ref, bv_ref,
    wo_ref, bo_ref,
    ln1g_ref, ln1b_ref,
    w1_ref, b1_ref, w2_ref, b2_ref,
    ln2g_ref, ln2b_ref,
    o_ref,
    *, num_layers: int, num_heads: int, mxu_dtype,
):
    x = x_ref[0]                          # (S, D) — one batch element per grid step
    S, D = x.shape
    H = num_heads
    Dh = D // H
    scale = 1.0 / math.sqrt(Dh)

    def layer_norm(h, g, b):
        mu = jnp.mean(h, axis=-1, keepdims=True)
        var = jnp.mean((h - mu) ** 2, axis=-1, keepdims=True)
        return (h - mu) * jax.lax.rsqrt(var + LN_EPS) * g + b

    # All layers inside one kernel; activations never leave the core between layers.
    for l in range(num_layers):           # static unroll (small N_LAYERS)
        xm = x.astype(mxu_dtype)
        xb = jnp.broadcast_to(xm, (H, S, D))          # cheap leading-axis broadcast

        # ---- per-head QKV projections, all heads in one batched matmul each ----
        q = jnp.einsum("hsd,hdf->hsf", xb, wq_ref[l].astype(mxu_dtype),
                       preferred_element_type=jnp.float32) + bq_ref[l]
        k = jnp.einsum("hsd,hdf->hsf", xb, wk_ref[l].astype(mxu_dtype),
                       preferred_element_type=jnp.float32) + bk_ref[l]
        v = jnp.einsum("hsd,hdf->hsf", xb, wv_ref[l].astype(mxu_dtype),
                       preferred_element_type=jnp.float32) + bv_ref[l]

        # ---- scaled dot-product attention, batched over heads ----
        s = jnp.einsum("hqf,hkf->hqk", q.astype(mxu_dtype), k.astype(mxu_dtype),
                       preferred_element_type=jnp.float32) * scale      # (H, S, S)
        s = s - jnp.max(s, axis=-1, keepdims=True)
        e = jnp.exp(s)                                                   # EUP
        inv = pl.reciprocal(jnp.sum(e, axis=-1, keepdims=True), approx=False)
        p = e * inv
        ctx = jnp.einsum("hqk,hkf->hqf", p.astype(mxu_dtype), v.astype(mxu_dtype),
                         preferred_element_type=jnp.float32)            # (H, S, Dh)

        # ---- output projection: per-head partial products, summed over heads ----
        attn_out = jnp.einsum(
            "hsf,hfd->hsd", ctx.astype(mxu_dtype), wo_ref[l].astype(mxu_dtype),
            preferred_element_type=jnp.float32).sum(axis=0) + bo_ref[l]  # (S, D)

        # ---- residual + LayerNorm 1 (post-norm) ----
        h1 = layer_norm(x + attn_out, ln1g_ref[l], ln1b_ref[l])

        # ---- feed-forward (relu), f32 accumulation ----
        f = jnp.dot(h1.astype(mxu_dtype), w1_ref[l].astype(mxu_dtype),
                    preferred_element_type=jnp.float32) + b1_ref[l]
        f = jnp.maximum(f, 0.0)
        f = jnp.dot(f.astype(mxu_dtype), w2_ref[l].astype(mxu_dtype),
                    preferred_element_type=jnp.float32) + b2_ref[l]

        # ---- residual + LayerNorm 2 ----
        x = layer_norm(h1 + f, ln2g_ref[l], ln2b_ref[l])

    o_ref[0] = x.astype(o_ref.dtype)


# ----------------------------- wrapper -----------------------------
def _stack_layer_params(layer_params, num_heads):
    """Stack per-layer weights along a leading layer axis and pre-split heads."""
    D = layer_params[0]["wq"].shape[0]
    H = num_heads
    Dh = D // H

    def per_head_in(w):      # (D, D) -> (H, D, Dh): split output dim into heads
        return w.reshape(D, H, Dh).transpose(1, 0, 2)

    def per_head_bias(b):    # (1, D) -> (H, 1, Dh)
        return b.reshape(H, Dh)[:, None, :]

    def per_head_out(w):     # (D, D) -> (H, Dh, D): split input dim into heads
        return w.reshape(H, Dh, D)

    ident = lambda a: a
    stk = lambda f, name: jnp.stack([f(p[name]) for p in layer_params])
    return dict(
        wq=stk(per_head_in, "wq"), bq=stk(per_head_bias, "bq"),
        wk=stk(per_head_in, "wk"), bk=stk(per_head_bias, "bk"),
        wv=stk(per_head_in, "wv"), bv=stk(per_head_bias, "bv"),
        wo=stk(per_head_out, "wo"), bo=stk(ident, "bo"),
        ln1_g=stk(ident, "ln1_g"), ln1_b=stk(ident, "ln1_b"),
        w1=stk(ident, "w1"), b1=stk(ident, "b1"),
        w2=stk(ident, "w2"), b2=stk(ident, "b2"),
        ln2_g=stk(ident, "ln2_g"), ln2_b=stk(ident, "ln2_b"),
    )


def transformer_encoder_pallas(x, layer_params, *, num_heads=N_HEADS,
                               mxu_dtype=jnp.float32):
    """TransformerEncoder.forward, fully fused into one pallas_call.

    x: (B, S, D) float32.  mxu_dtype=jnp.bfloat16 enables full-rate MXU on v6e/v7x
    (elementwise softmax / layernorm / relu math stays f32).
    """
    B, S, D = x.shape
    L = len(layer_params)
    F = layer_params[0]["w1"].shape[1]
    H = num_heads
    Dh = D // H

    sp = _stack_layer_params(layer_params, num_heads)

    def full(shape):
        nd = len(shape)
        return pl.BlockSpec(shape, lambda b, _nd=nd: (0,) * _nd)

    weight_specs = [
        full((L, H, D, Dh)), full((L, H, 1, Dh)),   # wq, bq
        full((L, H, D, Dh)), full((L, H, 1, Dh)),   # wk, bk
        full((L, H, D, Dh)), full((L, H, 1, Dh)),   # wv, bv
        full((L, H, Dh, D)), full((L, 1, D)),       # wo, bo
        full((L, 1, D)), full((L, 1, D)),           # ln1 gamma, beta
        full((L, D, F)), full((L, 1, F)),           # w1, b1
        full((L, F, D)), full((L, 1, D)),           # w2, b2
        full((L, 1, D)), full((L, 1, D)),           # ln2 gamma, beta
    ]

    kernel = functools.partial(_fused_encoder_kernel,
                               num_layers=L, num_heads=H, mxu_dtype=mxu_dtype)

    return pl.pallas_call(
        kernel,
        out_shape=jax.ShapeDtypeStruct((B, S, D), x.dtype),
        grid=(B,),
        in_specs=[pl.BlockSpec((1, S, D), lambda b: (b, 0, 0))] + weight_specs,
        out_specs=pl.BlockSpec((1, S, D), lambda b: (b, 0, 0)),
        compiler_params=pltpu.CompilerParams(dimension_semantics=("parallel",)),
    )(
        x,
        sp["wq"], sp["bq"], sp["wk"], sp["bk"], sp["wv"], sp["bv"],
        sp["wo"], sp["bo"],
        sp["ln1_g"], sp["ln1_b"],
        sp["w1"], sp["b1"], sp["w2"], sp["b2"],
        sp["ln2_g"], sp["ln2_b"],
    )


# ----------------------------- parameter init -----------------------------
def init_layer_params(key, d_model, dim_ff):
    ks = jax.random.split(key, 8)
    sd = 1.0 / math.sqrt(d_model)
    sf = 1.0 / math.sqrt(dim_ff)

    def lin(k, shape, scale):
        return jax.random.uniform(k, shape, jnp.float32, -1.0, 1.0) * scale

    return {
        "wq": lin(ks[0], (d_model, d_model), sd),
        "bq": jnp.zeros((1, d_model), jnp.float32),
        "wk": lin(ks[1], (d_model, d_model), sd),
        "bk": jnp.zeros((1, d_model), jnp.float32),
        "wv": lin(ks[2], (d_model, d_model), sd),
        "bv": jnp.zeros((1, d_model), jnp.float32),
        "wo": lin(ks[3], (d_model, d_model), sd),
        "bo": jnp.zeros((1, d_model), jnp.float32),
        "ln1_g": jnp.ones((1, d_model), jnp.float32),
        "ln1_b": jnp.zeros((1, d_model), jnp.float32),
        "w1": lin(ks[4], (d_model, dim_ff), sd),
        "b1": lin(ks[5], (1, dim_ff), sd),
        "w2": lin(ks[6], (dim_ff, d_model), sf),
        "b2": lin(ks[7], (1, d_model), sf),
        "ln2_g": jnp.ones((1, d_model), jnp.float32),
        "ln2_b": jnp.zeros((1, d_model), jnp.float32),
    }


# ----------------------------- pure-JAX reference -----------------------------
def _layer_ref(x, p, num_heads=N_HEADS):
    B, S, D = x.shape
    Dh = D // num_heads
    q = x @ p["wq"] + p["bq"]
    k = x @ p["wk"] + p["bk"]
    v = x @ p["wv"] + p["bv"]
    qh = q.reshape(B, S, num_heads, Dh).transpose(0, 2, 1, 3)
    kh = k.reshape(B, S, num_heads, Dh).transpose(0, 2, 1, 3)
    vh = v.reshape(B, S, num_heads, Dh).transpose(0, 2, 1, 3)
    s = jnp.einsum("bhqd,bhkd->bhqk", qh, kh) / math.sqrt(Dh)
    pattn = jax.nn.softmax(s, axis=-1)
    ctx = jnp.einsum("bhqk,bhkd->bhqd", pattn, vh).transpose(0, 2, 1, 3).reshape(B, S, D)
    attn_out = ctx @ p["wo"] + p["bo"]

    def ln(h, g, b):
        mu = h.mean(-1, keepdims=True)
        var = ((h - mu) ** 2).mean(-1, keepdims=True)
        return (h - mu) * jax.lax.rsqrt(var + LN_EPS) * g + b

    h1 = ln(x + attn_out, p["ln1_g"], p["ln1_b"])
    f = jnp.maximum(h1 @ p["w1"] + p["b1"], 0.0) @ p["w2"] + p["b2"]
    return ln(h1 + f, p["ln2_g"], p["ln2_b"])


def _encoder_ref(x, layer_params):
    for p in layer_params:
        x = _layer_ref(x, p)
    return x


# ----------------------------- main -----------------------------
if __name__ == "__main__":
    key = jax.random.PRNGKey(0)
    kx, *kls = jax.random.split(key, 1 + N_LAYERS)

    src = jax.random.normal(kx, (BATCH, SEQ, D_MODEL), jnp.float32)
    layer_params = [init_layer_params(k, D_MODEL, DIM_FF) for k in kls]

    ref = _encoder_ref(src, layer_params)

    # f32 MXU path: bit-for-bit comparable to the PyTorch/JAX reference semantics.
    out = transformer_encoder_pallas(src, layer_params)
    out = jax.block_until_ready(out)
    assert out.shape == (BATCH, SEQ, D_MODEL)
    assert jnp.allclose(out, ref, rtol=1e-4, atol=1e-4), "mismatch vs pure-JAX reference"

    # bf16-MXU path (recommended on v6e/v7x): loose smoke-check only, since bf16
    # operands intentionally change numerics.
    out_bf16 = transformer_encoder_pallas(src, layer_params, mxu_dtype=jnp.bfloat16)
    out_bf16 = jax.block_until_ready(out_bf16)
    assert jnp.allclose(out_bf16, ref, rtol=1e-1, atol=1e-1), "bf16 path diverged"

    print("KERNEL_OK")
</pallas_src>

<mosaic_0001>
module attributes {stable_mosaic.version = 11 : i64} {
  func.func @_fused_encoder_kernel(%arg0: i32, %arg1: memref<1x8x32xf32, #tpu.memory_space<vmem>>, %arg2: memref<2x4x32x8xf32, #tpu.memory_space<vmem>>, %arg3: memref<2x4x1x8xf32, #tpu.memory_space<vmem>>, %arg4: memref<2x4x32x8xf32, #tpu.memory_space<vmem>>, %arg5: memref<2x4x1x8xf32, #tpu.memory_space<vmem>>, %arg6: memref<2x4x32x8xf32, #tpu.memory_space<vmem>>, %arg7: memref<2x4x1x8xf32, #tpu.memory_space<vmem>>, %arg8: memref<2x4x8x32xf32, #tpu.memory_space<vmem>>, %arg9: memref<2x1x32xf32, #tpu.memory_space<vmem>>, %arg10: memref<2x1x32xf32, #tpu.memory_space<vmem>>, %arg11: memref<2x1x32xf32, #tpu.memory_space<vmem>>, %arg12: memref<2x32x64xf32, #tpu.memory_space<vmem>>, %arg13: memref<2x1x64xf32, #tpu.memory_space<vmem>>, %arg14: memref<2x64x32xf32, #tpu.memory_space<vmem>>, %arg15: memref<2x1x32xf32, #tpu.memory_space<vmem>>, %arg16: memref<2x1x32xf32, #tpu.memory_space<vmem>>, %arg17: memref<2x1x32xf32, #tpu.memory_space<vmem>>, %arg18: memref<1x8x32xf32, #tpu.memory_space<vmem>>) attributes {dimension_semantics = [#tpu.dimension_semantics<parallel>], iteration_bounds = array<i64: 2>, scalar_prefetch = 0 : i64, scratch_operands = 0 : i64, tpu.core_type = #tpu.core_type<tc>, window_params = [{transform_indices = @transform_0, window_bounds = array<i64: 1, 8, 32>}, {pipeline_mode = #tpu.pipeline_mode<synchronous>, transform_indices = @transform_1, window_bounds = array<i64: 2, 4, 32, 8>}, {pipeline_mode = #tpu.pipeline_mode<synchronous>, transform_indices = @transform_2, window_bounds = array<i64: 2, 4, 1, 8>}, {pipeline_mode = #tpu.pipeline_mode<synchronous>, transform_indices = @transform_3, window_bounds = array<i64: 2, 4, 32, 8>}, {pipeline_mode = #tpu.pipeline_mode<synchronous>, transform_indices = @transform_4, window_bounds = array<i64: 2, 4, 1, 8>}, {pipeline_mode = #tpu.pipeline_mode<synchronous>, transform_indices = @transform_5, window_bounds = array<i64: 2, 4, 32, 8>}, {pipeline_mode = #tpu.pipeline_mode<synchronous>, transform_indices = @transform_6, window_bounds = array<i64: 2, 4, 1, 8>}, {pipeline_mode = #tpu.pipeline_mode<synchronous>, transform_indices = @transform_7, window_bounds = array<i64: 2, 4, 8, 32>}, {pipeline_mode = #tpu.pipeline_mode<synchronous>, transform_indices = @transform_8, window_bounds = array<i64: 2, 1, 32>}, {pipeline_mode = #tpu.pipeline_mode<synchronous>, transform_indices = @transform_9, window_bounds = array<i64: 2, 1, 32>}, {pipeline_mode = #tpu.pipeline_mode<synchronous>, transform_indices = @transform_10, window_bounds = array<i64: 2, 1, 32>}, {pipeline_mode = #tpu.pipeline_mode<synchronous>, transform_indices = @transform_11, window_bounds = array<i64: 2, 32, 64>}, {pipeline_mode = #tpu.pipeline_mode<synchronous>, transform_indices = @transform_12, window_bounds = array<i64: 2, 1, 64>}, {pipeline_mode = #tpu.pipeline_mode<synchronous>, transform_indices = @transform_13, window_bounds = array<i64: 2, 64, 32>}, {pipeline_mode = #tpu.pipeline_mode<synchronous>, transform_indices = @transform_14, window_bounds = array<i64: 2, 1, 32>}, {pipeline_mode = #tpu.pipeline_mode<synchronous>, transform_indices = @transform_15, window_bounds = array<i64: 2, 1, 32>}, {pipeline_mode = #tpu.pipeline_mode<synchronous>, transform_indices = @transform_16, window_bounds = array<i64: 2, 1, 32>}, {transform_indices = @transform_17, window_bounds = array<i64: 1, 8, 32>}]} {
    %c0 = arith.constant 0 : index
    %c0_0 = arith.constant 0 : index
    %c0_1 = arith.constant 0 : index
    %0 = vector.load %arg1[%c0, %c0_0, %c0_1] : memref<1x8x32xf32, #tpu.memory_space<vmem>>, vector<1x8x32xf32>
    %1 = vector.shape_cast %0 : vector<1x8x32xf32> to vector<8x32xf32>
    %2 = vector.shape_cast %1 : vector<8x32xf32> to vector<1x8x32xf32>
    %3 = vector.broadcast %2 : vector<1x8x32xf32> to vector<4x8x32xf32>
    %c0_2 = arith.constant 0 : index
    %c0_3 = arith.constant 0 : index
    %c0_4 = arith.constant 0 : index
    %c0_5 = arith.constant 0 : index
    %4 = vector.load %arg2[%c0_2, %c0_3, %c0_4, %c0_5] : memref<2x4x32x8xf32, #tpu.memory_space<vmem>>, vector<1x4x32x8xf32>
    %5 = vector.shape_cast %4 : vector<1x4x32x8xf32> to vector<4x32x8xf32>
    "tpu.trace_start"() <{level = 10 : i32, message = "hsd,hdf->hsf"}> : () -> ()
    %cst = arith.constant dense<0.000000e+00> : vector<4x8x8xf32>
    %6 = tpu.matmul %3, %5, %cst {dimension_numbers = #tpu.dot_dimension_numbers<[2], [1], [1], [2], [0, 0, 0, 1, 1, 2], [0], [0]>} : vector<4x8x32xf32>, vector<4x32x8xf32>, vector<4x8x8xf32> -> vector<4x8x8xf32>
    "tpu.trace_stop"() : () -> ()
    %c0_6 = arith.constant 0 : index
    %c0_7 = arith.constant 0 : index
    %c0_8 = arith.constant 0 : index
    %c0_9 = arith.constant 0 : index
    %7 = vector.load %arg3[%c0_6, %c0_7, %c0_8, %c0_9] : memref<2x4x1x8xf32, #tpu.memory_space<vmem>>, vector<1x4x1x8xf32>
    %8 = vector.shape_cast %7 : vector<1x4x1x8xf32> to vector<4x1x8xf32>
    %9 = vector.broadcast %8 : vector<4x1x8xf32> to vector<4x8x8xf32>
    %10 = arith.addf %6, %9 : vector<4x8x8xf32>
    %c0_10 = arith.constant 0 : index
    %c0_11 = arith.constant 0 : index
    %c0_12 = arith.constant 0 : index
    %c0_13 = arith.constant 0 : index
    %11 = vector.load %arg4[%c0_10, %c0_11, %c0_12, %c0_13] : memref<2x4x32x8xf32, #tpu.memory_space<vmem>>, vector<1x4x32x8xf32>
    %12 = vector.shape_cast %11 : vector<1x4x32x8xf32> to vector<4x32x8xf32>
    "tpu.trace_start"() <{level = 10 : i32, message = "hsd,hdf->hsf"}> : () -> ()
    %cst_14 = arith.constant dense<0.000000e+00> : vector<4x8x8xf32>
    %13 = tpu.matmul %3, %12, %cst_14 {dimension_numbers = #tpu.dot_dimension_numbers<[2], [1], [1], [2], [0, 0, 0, 1, 1, 2], [0], [0]>} : vector<4x8x32xf32>, vector<4x32x8xf32>, vector<4x8x8xf32> -> vector<4x8x8xf32>
    "tpu.trace_stop"() : () -> ()
    %c0_15 = arith.constant 0 : index
    %c0_16 = arith.constant 0 : index
    %c0_17 = arith.constant 0 : index
    %c0_18 = arith.constant 0 : index
    %14 = vector.load %arg5[%c0_15, %c0_16, %c0_17, %c0_18] : memref<2x4x1x8xf32, #tpu.memory_space<vmem>>, vector<1x4x1x8xf32>
    %15 = vector.shape_cast %14 : vector<1x4x1x8xf32> to vector<4x1x8xf32>
    %16 = vector.broadcast %15 : vector<4x1x8xf32> to vector<4x8x8xf32>
    %17 = arith.addf %13, %16 : vector<4x8x8xf32>
    %c0_19 = arith.constant 0 : index
    %c0_20 = arith.constant 0 : index
    %c0_21 = arith.constant 0 : index
    %c0_22 = arith.constant 0 : index
    %18 = vector.load %arg6[%c0_19, %c0_20, %c0_21, %c0_22] : memref<2x4x32x8xf32, #tpu.memory_space<vmem>>, vector<1x4x32x8xf32>
    %19 = vector.shape_cast %18 : vector<1x4x32x8xf32> to vector<4x32x8xf32>
    "tpu.trace_start"() <{level = 10 : i32, message = "hsd,hdf->hsf"}> : () -> ()
    %cst_23 = arith.constant dense<0.000000e+00> : vector<4x8x8xf32>
    %20 = tpu.matmul %3, %19, %cst_23 {dimension_numbers = #tpu.dot_dimension_numbers<[2], [1], [1], [2], [0, 0, 0, 1, 1, 2], [0], [0]>} : vector<4x8x32xf32>, vector<4x32x8xf32>, vector<4x8x8xf32> -> vector<4x8x8xf32>
    "tpu.trace_stop"() : () -> ()
    %c0_24 = arith.constant 0 : index
    %c0_25 = arith.constant 0 : index
    %c0_26 = arith.constant 0 : index
    %c0_27 = arith.constant 0 : index
    %21 = vector.load %arg7[%c0_24, %c0_25, %c0_26, %c0_27] : memref<2x4x1x8xf32, #tpu.memory_space<vmem>>, vector<1x4x1x8xf32>
    %22 = vector.shape_cast %21 : vector<1x4x1x8xf32> to vector<4x1x8xf32>
    %23 = vector.broadcast %22 : vector<4x1x8xf32> to vector<4x8x8xf32>
    %24 = arith.addf %20, %23 : vector<4x8x8xf32>
    "tpu.trace_start"() <{level = 10 : i32, message = "hqf,hkf->hqk"}> : () -> ()
    %cst_28 = arith.constant dense<0.000000e+00> : vector<4x8x8xf32>
    %25 = tpu.matmul %10, %17, %cst_28 {dimension_numbers = #tpu.dot_dimension_numbers<[2], [2], [1], [1], [0, 0, 0, 1, 1, 1], [0], [0]>} : vector<4x8x8xf32>, vector<4x8x8xf32>, vector<4x8x8xf32> -> vector<4x8x8xf32>
    "tpu.trace_stop"() : () -> ()
    %cst_29 = arith.constant 0.353553385 : f32
    %26 = vector.broadcast %cst_29 : f32 to vector<4x8x8xf32>
    %27 = arith.mulf %25, %26 : vector<4x8x8xf32>
    %cst_30 = arith.constant dense<0xFF800000> : vector<4x8xf32>
    %28 = vector.multi_reduction <maximumf>, %27, %cst_30 [2] : vector<4x8x8xf32> to vector<4x8xf32>
    %29 = vector.shape_cast %28 : vector<4x8xf32> to vector<4x8x1xf32>
    %30 = vector.broadcast %29 : vector<4x8x1xf32> to vector<4x8x8xf32>
    %31 = arith.subf %27, %30 : vector<4x8x8xf32>
    %32 = math.exp %31 : vector<4x8x8xf32>
    %cst_31 = arith.constant dense<0.000000e+00> : vector<4x8xf32>
    %33 = vector.multi_reduction <add>, %32, %cst_31 [2] : vector<4x8x8xf32> to vector<4x8xf32>
    %34 = vector.shape_cast %33 : vector<4x8xf32> to vector<4x8x1xf32>
    %35 = tpu.reciprocal %34 : vector<4x8x1xf32> -> vector<4x8x1xf32>
    %36 = vector.broadcast %35 : vector<4x8x1xf32> to vector<4x8x8xf32>
    %37 = arith.mulf %32, %36 : vector<4x8x8xf32>
    "tpu.trace_start"() <{level = 10 : i32, message = "hqk,hkf->hqf"}> : () -> ()
    %cst_32 = arith.constant dense<0.000000e+00> : vector<4x8x8xf32>
    %38 = tpu.matmul %37, %24, %cst_32 {dimension_numbers = #tpu.dot_dimension_numbers<[2], [1], [1], [2], [0, 0, 0, 1, 1, 2], [0], [0]>} : vector<4x8x8xf32>, vector<4x8x8xf32>, vector<4x8x8xf32> -> vector<4x8x8xf32>
    "tpu.trace_stop"() : () -> ()
    %c0_33 = arith.constant 0 : index
    %c0_34 = arith.constant 0 : index
    %c0_35 = arith.constant 0 : index
    %c0_36 = arith.constant 0 : index
    %39 = vector.load %arg8[%c0_33, %c0_34, %c0_35, %c0_36] : memref<2x4x8x32xf32, #tpu.memory_space<vmem>>, vector<1x4x8x32xf32>
    %40 = vector.shape_cast %39 : vector<1x4x8x32xf32> to vector<4x8x32xf32>
    "tpu.trace_start"() <{level = 10 : i32, message = "hsf,hfd->hsd"}> : () -> ()
    %cst_37 = arith.constant dense<0.000000e+00> : vector<4x8x32xf32>
    %41 = tpu.matmul %38, %40, %cst_37 {dimension_numbers = #tpu.dot_dimension_numbers<[2], [1], [1], [2], [0, 0, 0, 1, 1, 2], [0], [0]>} : vector<4x8x8xf32>, vector<4x8x32xf32>, vector<4x8x32xf32> -> vector<4x8x32xf32>
    "tpu.trace_stop"() : () -> ()
    %cst_38 = arith.constant dense<0.000000e+00> : vector<8x32xf32>
    %42 = vector.multi_reduction <add>, %41, %cst_38 [0] : vector<4x8x32xf32> to vector<8x32xf32>
    %c0_39 = arith.constant 0 : index
    %c0_40 = arith.constant 0 : index
    %c0_41 = arith.constant 0 : index
    %43 = vector.load %arg9[%c0_39, %c0_40, %c0_41] : memref<2x1x32xf32, #tpu.memory_space<vmem>>, vector<1x1x32xf32>
    %44 = vector.shape_cast %43 : vector<1x1x32xf32> to vector<1x32xf32>
    %45 = vector.broadcast %44 : vector<1x32xf32> to vector<8x32xf32>
    %46 = arith.addf %42, %45 : vector<8x32xf32>
    %47 = arith.addf %1, %46 : vector<8x32xf32>
    %c0_42 = arith.constant 0 : index
    %c0_43 = arith.constant 0 : index
    %c0_44 = arith.constant 0 : index
    %48 = vector.load %arg10[%c0_42, %c0_43, %c0_44] : memref<2x1x32xf32, #tpu.memory_space<vmem>>, vector<1x1x32xf32>
    %49 = vector.shape_cast %48 : vector<1x1x32xf32> to vector<1x32xf32>
    %c0_45 = arith.constant 0 : index
    %c0_46 = arith.constant 0 : index
    %c0_47 = arith.constant 0 : index
    %50 = vector.load %arg11[%c0_45, %c0_46, %c0_47] : memref<2x1x32xf32, #tpu.memory_space<vmem>>, vector<1x1x32xf32>
    %51 = vector.shape_cast %50 : vector<1x1x32xf32> to vector<1x32xf32>
    %cst_48 = arith.constant dense<0.000000e+00> : vector<8xf32>
    %52 = vector.multi_reduction <add>, %47, %cst_48 [1] : vector<8x32xf32> to vector<8xf32>
    %53 = vector.shape_cast %52 : vector<8xf32> to vector<8x1xf32>
    %cst_49 = arith.constant 3.200000e+01 : f32
    %54 = vector.broadcast %cst_49 : f32 to vector<8x1xf32>
    %55 = arith.divf %53, %54 : vector<8x1xf32>
    %56 = vector.broadcast %55 : vector<8x1xf32> to vector<8x32xf32>
    %57 = arith.subf %47, %56 : vector<8x32xf32>
    %58 = arith.mulf %57, %57 : vector<8x32xf32>
    %cst_50 = arith.constant dense<0.000000e+00> : vector<8xf32>
    %59 = vector.multi_reduction <add>, %58, %cst_50 [1] : vector<8x32xf32> to vector<8xf32>
    %60 = vector.shape_cast %59 : vector<8xf32> to vector<8x1xf32>
    %cst_51 = arith.constant 3.200000e+01 : f32
    %61 = vector.broadcast %cst_51 : f32 to vector<8x1xf32>
    %62 = arith.divf %60, %61 : vector<8x1xf32>
    %63 = vector.broadcast %55 : vector<8x1xf32> to vector<8x32xf32>
    %64 = arith.subf %47, %63 : vector<8x32xf32>
    %cst_52 = arith.constant 9.99999974E-6 : f32
    %65 = vector.broadcast %cst_52 : f32 to vector<8x1xf32>
    %66 = arith.addf %62, %65 : vector<8x1xf32>
    %67 = math.rsqrt %66 : vector<8x1xf32>
    %68 = vector.broadcast %67 : vector<8x1xf32> to vector<8x32xf32>
    %69 = arith.mulf %64, %68 : vector<8x32xf32>
    %70 = vector.broadcast %49 : vector<1x32xf32> to vector<8x32xf32>
    %71 = arith.mulf %69, %70 : vector<8x32xf32>
    %72 = vector.broadcast %51 : vector<1x32xf32> to vector<8x32xf32>
    %73 = arith.addf %71, %72 : vector<8x32xf32>
    %c0_53 = arith.constant 0 : index
    %c0_54 = arith.constant 0 : index
    %c0_55 = arith.constant 0 : index
    %74 = vector.load %arg12[%c0_53, %c0_54, %c0_55] : memref<2x32x64xf32, #tpu.memory_space<vmem>>, vector<1x32x64xf32>
    %75 = vector.shape_cast %74 : vector<1x32x64xf32> to vector<32x64xf32>
    %cst_56 = arith.constant dense<0.000000e+00> : vector<8x64xf32>
    %76 = tpu.matmul %73, %75, %cst_56 {dimension_numbers = #tpu.dot_dimension_numbers<[1], [0], [0], [1], [0, 0, 1, 1], [], []>} : vector<8x32xf32>, vector<32x64xf32>, vector<8x64xf32> -> vector<8x64xf32>
    %c0_57 = arith.constant 0 : index
    %c0_58 = arith.constant 0 : index
    %c0_59 = arith.constant 0 : index
    %77 = vector.load %arg13[%c0_57, %c0_58, %c0_59] : memref<2x1x64xf32, #tpu.memory_space<vmem>>, vector<1x1x64xf32>
    %78 = vector.shape_cast %77 : vector<1x1x64xf32> to vector<1x64xf32>
    %79 = vector.broadcast %78 : vector<1x64xf32> to vector<8x64xf32>
    %80 = arith.addf %76, %79 : vector<8x64xf32>
    %cst_60 = arith.constant 0.000000e+00 : f32
    %81 = vector.broadcast %cst_60 : f32 to vector<8x64xf32>
    %82 = arith.maximumf %80, %81 : vector<8x64xf32>
    %c0_61 = arith.constant 0 : index
    %c0_62 = arith.constant 0 : index
    %c0_63 = arith.constant 0 : index
    %83 = vector.load %arg14[%c0_61, %c0_62, %c0_63] : memref<2x64x32xf32, #tpu.memory_space<vmem>>, vector<1x64x32xf32>
    %84 = vector.shape_cast %83 : vector<1x64x32xf32> to vector<64x32xf32>
    %cst_64 = arith.constant dense<0.000000e+00> : vector<8x32xf32>
    %85 = tpu.matmul %82, %84, %cst_64 {dimension_numbers = #tpu.dot_dimension_numbers<[1], [0], [0], [1], [0, 0, 1, 1], [], []>} : vector<8x64xf32>, vector<64x32xf32>, vector<8x32xf32> -> vector<8x32xf32>
    %c0_65 = arith.constant 0 : index
    %c0_66 = arith.constant 0 : index
    %c0_67 = arith.constant 0 : index
    %86 = vector.load %arg15[%c0_65, %c0_66, %c0_67] : memref<2x1x32xf32, #tpu.memory_space<vmem>>, vector<1x1x32xf32>
    %87 = vector.shape_cast %86 : vector<1x1x32xf32> to vector<1x32xf32>
    %88 = vector.broadcast %87 : vector<1x32xf32> to vector<8x32xf32>
    %89 = arith.addf %85, %88 : vector<8x32xf32>
    %90 = arith.addf %73, %89 : vector<8x32xf32>
    %c0_68 = arith.constant 0 : index
    %c0_69 = arith.constant 0 : index
    %c0_70 = arith.constant 0 : index
    %91 = vector.load %arg16[%c0_68, %c0_69, %c0_70] : memref<2x1x32xf32, #tpu.memory_space<vmem>>, vector<1x1x32xf32>
    %92 = vector.shape_cast %91 : vector<1x1x32xf32> to vector<1x32xf32>
    %c0_71 = arith.constant 0 : index
    %c0_72 = arith.constant 0 : index
    %c0_73 = arith.constant 0 : index
    %93 = vector.load %arg17[%c0_71, %c0_72, %c0_73] : memref<2x1x32xf32, #tpu.memory_space<vmem>>, vector<1x1x32xf32>
    %94 = vector.shape_cast %93 : vector<1x1x32xf32> to vector<1x32xf32>
    %cst_74 = arith.constant dense<0.000000e+00> : vector<8xf32>
    %95 = vector.multi_reduction <add>, %90, %cst_74 [1] : vector<8x32xf32> to vector<8xf32>
    %96 = vector.shape_cast %95 : vector<8xf32> to vector<8x1xf32>
    %cst_75 = arith.constant 3.200000e+01 : f32
    %97 = vector.broadcast %cst_75 : f32 to vector<8x1xf32>
    %98 = arith.divf %96, %97 : vector<8x1xf32>
    %99 = vector.broadcast %98 : vector<8x1xf32> to vector<8x32xf32>
    %100 = arith.subf %90, %99 : vector<8x32xf32>
    %101 = arith.mulf %100, %100 : vector<8x32xf32>
    %cst_76 = arith.constant dense<0.000000e+00> : vector<8xf32>
    %102 = vector.multi_reduction <add>, %101, %cst_76 [1] : vector<8x32xf32> to vector<8xf32>
    %103 = vector.shape_cast %102 : vector<8xf32> to vector<8x1xf32>
    %cst_77 = arith.constant 3.200000e+01 : f32
    %104 = vector.broadcast %cst_77 : f32 to vector<8x1xf32>
    %105 = arith.divf %103, %104 : vector<8x1xf32>
    %106 = vector.broadcast %98 : vector<8x1xf32> to vector<8x32xf32>
    %107 = arith.subf %90, %106 : vector<8x32xf32>
    %cst_78 = arith.constant 9.99999974E-6 : f32
    %108 = vector.broadcast %cst_78 : f32 to vector<8x1xf32>
    %109 = arith.addf %105, %108 : vector<8x1xf32>
    %110 = math.rsqrt %109 : vector<8x1xf32>
    %111 = vector.broadcast %110 : vector<8x1xf32> to vector<8x32xf32>
    %112 = arith.mulf %107, %111 : vector<8x32xf32>
    %113 = vector.broadcast %92 : vector<1x32xf32> to vector<8x32xf32>
    %114 = arith.mulf %112, %113 : vector<8x32xf32>
    %115 = vector.broadcast %94 : vector<1x32xf32> to vector<8x32xf32>
    %116 = arith.addf %114, %115 : vector<8x32xf32>
    %117 = vector.shape_cast %116 : vector<8x32xf32> to vector<1x8x32xf32>
    %118 = vector.broadcast %117 : vector<1x8x32xf32> to vector<4x8x32xf32>
    %c1 = arith.constant 1 : index
    %c0_79 = arith.constant 0 : index
    %c0_80 = arith.constant 0 : index
    %c0_81 = arith.constant 0 : index
    %119 = vector.load %arg2[%c1, %c0_79, %c0_80, %c0_81] : memref<2x4x32x8xf32, #tpu.memory_space<vmem>>, vector<1x4x32x8xf32>
    %120 = vector.shape_cast %119 : vector<1x4x32x8xf32> to vector<4x32x8xf32>
    "tpu.trace_start"() <{level = 10 : i32, message = "hsd,hdf->hsf"}> : () -> ()
    %cst_82 = arith.constant dense<0.000000e+00> : vector<4x8x8xf32>
    %121 = tpu.matmul %118, %120, %cst_82 {dimension_numbers = #tpu.dot_dimension_numbers<[2], [1], [1], [2], [0, 0, 0, 1, 1, 2], [0], [0]>} : vector<4x8x32xf32>, vector<4x32x8xf32>, vector<4x8x8xf32> -> vector<4x8x8xf32>
    "tpu.trace_stop"() : () -> ()
    %c1_83 = arith.constant 1 : index
    %c0_84 = arith.constant 0 : index
    %c0_85 = arith.constant 0 : index
    %c0_86 = arith.constant 0 : index
    %122 = vector.load %arg3[%c1_83, %c0_84, %c0_85, %c0_86] : memref<2x4x1x8xf32, #tpu.memory_space<vmem>>, vector<1x4x1x8xf32>
    %123 = vector.shape_cast %122 : vector<1x4x1x8xf32> to vector<4x1x8xf32>
    %124 = vector.broadcast %123 : vector<4x1x8xf32> to vector<4x8x8xf32>
    %125 = arith.addf %121, %124 : vector<4x8x8xf32>
    %c1_87 = arith.constant 1 : index
    %c0_88 = arith.constant 0 : index
    %c0_89 = arith.constant 0 : index
    %c0_90 = arith.constant 0 : index
    %126 = vector.load %arg4[%c1_87, %c0_88, %c0_89, %c0_90] : memref<2x4x32x8xf32, #tpu.memory_space<vmem>>, vector<1x4x32x8xf32>
    %127 = vector.shape_cast %126 : vector<1x4x32x8xf32> to vector<4x32x8xf32>
    "tpu.trace_start"() <{level = 10 : i32, message = "hsd,hdf->hsf"}> : () -> ()
    %cst_91 = arith.constant dense<0.000000e+00> : vector<4x8x8xf32>
    %128 = tpu.matmul %118, %127, %cst_91 {dimension_numbers = #tpu.dot_dimension_numbers<[2], [1], [1], [2], [0, 0, 0, 1, 1, 2], [0], [0]>} : vector<4x8x32xf32>, vector<4x32x8xf32>, vector<4x8x8xf32> -> vector<4x8x8xf32>
    "tpu.trace_stop"() : () -> ()
    %c1_92 = arith.constant 1 : index
    %c0_93 = arith.constant 0 : index
    %c0_94 = arith.constant 0 : index
    %c0_95 = arith.constant 0 : index
    %129 = vector.load %arg5[%c1_92, %c0_93, %c0_94, %c0_95] : memref<2x4x1x8xf32, #tpu.memory_space<vmem>>, vector<1x4x1x8xf32>
    %130 = vector.shape_cast %129 : vector<1x4x1x8xf32> to vector<4x1x8xf32>
    %131 = vector.broadcast %130 : vector<4x1x8xf32> to vector<4x8x8xf32>
    %132 = arith.addf %128, %131 : vector<4x8x8xf32>
    %c1_96 = arith.constant 1 : index
    %c0_97 = arith.constant 0 : index
    %c0_98 = arith.constant 0 : index
    %c0_99 = arith.constant 0 : index
    %133 = vector.load %arg6[%c1_96, %c0_97, %c0_98, %c0_99] : memref<2x4x32x8xf32, #tpu.memory_space<vmem>>, vector<1x4x32x8xf32>
    %134 = vector.shape_cast %133 : vector<1x4x32x8xf32> to vector<4x32x8xf32>
    "tpu.trace_start"() <{level = 10 : i32, message = "hsd,hdf->hsf"}> : () -> ()
    %cst_100 = arith.constant dense<0.000000e+00> : vector<4x8x8xf32>
    %135 = tpu.matmul %118, %134, %cst_100 {dimension_numbers = #tpu.dot_dimension_numbers<[2], [1], [1], [2], [0, 0, 0, 1, 1, 2], [0], [0]>} : vector<4x8x32xf32>, vector<4x32x8xf32>, vector<4x8x8xf32> -> vector<4x8x8xf32>
    "tpu.trace_stop"() : () -> ()
    %c1_101 = arith.constant 1 : index
    %c0_102 = arith.constant 0 : index
    %c0_103 = arith.constant 0 : index
    %c0_104 = arith.constant 0 : index
    %136 = vector.load %arg7[%c1_101, %c0_102, %c0_103, %c0_104] : memref<2x4x1x8xf32, #tpu.memory_space<vmem>>, vector<1x4x1x8xf32>
    %137 = vector.shape_cast %136 : vector<1x4x1x8xf32> to vector<4x1x8xf32>
    %138 = vector.broadcast %137 : vector<4x1x8xf32> to vector<4x8x8xf32>
    %139 = arith.addf %135, %138 : vector<4x8x8xf32>
    "tpu.trace_start"() <{level = 10 : i32, message = "hqf,hkf->hqk"}> : () -> ()
    %cst_105 = arith.constant dense<0.000000e+00> : vector<4x8x8xf32>
    %140 = tpu.matmul %125, %132, %cst_105 {dimension_numbers = #tpu.dot_dimension_numbers<[2], [2], [1], [1], [0, 0, 0, 1, 1, 1], [0], [0]>} : vector<4x8x8xf32>, vector<4x8x8xf32>, vector<4x8x8xf32> -> vector<4x8x8xf32>
    "tpu.trace_stop"() : () -> ()
    %cst_106 = arith.constant 0.353553385 : f32
    %141 = vector.broadcast %cst_106 : f32 to vector<4x8x8xf32>
    %142 = arith.mulf %140, %141 : vector<4x8x8xf32>
    %cst_107 = arith.constant dense<0xFF800000> : vector<4x8xf32>
    %143 = vector.multi_reduction <maximumf>, %142, %cst_107 [2] : vector<4x8x8xf32> to vector<4x8xf32>
    %144 = vector.shape_cast %143 : vector<4x8xf32> to vector<4x8x1xf32>
    %145 = vector.broadcast %144 : vector<4x8x1xf32> to vector<4x8x8xf32>
    %146 = arith.subf %142, %145 : vector<4x8x8xf32>
    %147 = math.exp %146 : vector<4x8x8xf32>
    %cst_108 = arith.constant dense<0.000000e+00> : vector<4x8xf32>
    %148 = vector.multi_reduction <add>, %147, %cst_108 [2] : vector<4x8x8xf32> to vector<4x8xf32>
    %149 = vector.shape_cast %148 : vector<4x8xf32> to vector<4x8x1xf32>
    %150 = tpu.reciprocal %149 : vector<4x8x1xf32> -> vector<4x8x1xf32>
    %151 = vector.broadcast %150 : vector<4x8x1xf32> to vector<4x8x8xf32>
    %152 = arith.mulf %147, %151 : vector<4x8x8xf32>
    "tpu.trace_start"() <{level = 10 : i32, message = "hqk,hkf->hqf"}> : () -> ()
    %cst_109 = arith.constant dense<0.000000e+00> : vector<4x8x8xf32>
    %153 = tpu.matmul %152, %139, %cst_109 {dimension_numbers = #tpu.dot_dimension_numbers<[2], [1], [1], [2], [0, 0, 0, 1, 1, 2], [0], [0]>} : vector<4x8x8xf32>, vector<4x8x8xf32>, vector<4x8x8xf32> -> vector<4x8x8xf32>
    "tpu.trace_stop"() : () -> ()
    %c1_110 = arith.constant 1 : index
    %c0_111 = arith.constant 0 : index
    %c0_112 = arith.constant 0 : index
    %c0_113 = arith.constant 0 : index
    %154 = vector.load %arg8[%c1_110, %c0_111, %c0_112, %c0_113] : memref<2x4x8x32xf32, #tpu.memory_space<vmem>>, vector<1x4x8x32xf32>
    %155 = vector.shape_cast %154 : vector<1x4x8x32xf32> to vector<4x8x32xf32>
    "tpu.trace_start"() <{level = 10 : i32, message = "hsf,hfd->hsd"}> : () -> ()
    %cst_114 = arith.constant dense<0.000000e+00> : vector<4x8x32xf32>
    %156 = tpu.matmul %153, %155, %cst_114 {dimension_numbers = #tpu.dot_dimension_numbers<[2], [1], [1], [2], [0, 0, 0, 1, 1, 2], [0], [0]>} : vector<4x8x8xf32>, vector<4x8x32xf32>, vector<4x8x32xf32> -> vector<4x8x32xf32>
    "tpu.trace_stop"() : () -> ()
    %cst_115 = arith.constant dense<0.000000e+00> : vector<8x32xf32>
    %157 = vector.multi_reduction <add>, %156, %cst_115 [0] : vector<4x8x32xf32> to vector<8x32xf32>
    %c1_116 = arith.constant 1 : index
    %c0_117 = arith.constant 0 : index
    %c0_118 = arith.constant 0 : index
    %158 = vector.load %arg9[%c1_116, %c0_117, %c0_118] : memref<2x1x32xf32, #tpu.memory_space<vmem>>, vector<1x1x32xf32>
    %159 = vector.shape_cast %158 : vector<1x1x32xf32> to vector<1x32xf32>
    %160 = vector.broadcast %159 : vector<1x32xf32> to vector<8x32xf32>
    %161 = arith.addf %157, %160 : vector<8x32xf32>
    %162 = arith.addf %116, %161 : vector<8x32xf32>
    %c1_119 = arith.constant 1 : index
    %c0_120 = arith.constant 0 : index
    %c0_121 = arith.constant 0 : index
    %163 = vector.load %arg10[%c1_119, %c0_120, %c0_121] : memref<2x1x32xf32, #tpu.memory_space<vmem>>, vector<1x1x32xf32>
    %164 = vector.shape_cast %163 : vector<1x1x32xf32> to vector<1x32xf32>
    %c1_122 = arith.constant 1 : index
    %c0_123 = arith.constant 0 : index
    %c0_124 = arith.constant 0 : index
    %165 = vector.load %arg11[%c1_122, %c0_123, %c0_124] : memref<2x1x32xf32, #tpu.memory_space<vmem>>, vector<1x1x32xf32>
    %166 = vector.shape_cast %165 : vector<1x1x32xf32> to vector<1x32xf32>
    %cst_125 = arith.constant dense<0.000000e+00> : vector<8xf32>
    %167 = vector.multi_reduction <add>, %162, %cst_125 [1] : vector<8x32xf32> to vector<8xf32>
    %168 = vector.shape_cast %167 : vector<8xf32> to vector<8x1xf32>
    %cst_126 = arith.constant 3.200000e+01 : f32
    %169 = vector.broadcast %cst_126 : f32 to vector<8x1xf32>
    %170 = arith.divf %168, %169 : vector<8x1xf32>
    %171 = vector.broadcast %170 : vector<8x1xf32> to vector<8x32xf32>
    %172 = arith.subf %162, %171 : vector<8x32xf32>
    %173 = arith.mulf %172, %172 : vector<8x32xf32>
    %cst_127 = arith.constant dense<0.000000e+00> : vector<8xf32>
    %174 = vector.multi_reduction <add>, %173, %cst_127 [1] : vector<8x32xf32> to vector<8xf32>
    %175 = vector.shape_cast %174 : vector<8xf32> to vector<8x1xf32>
    %cst_128 = arith.constant 3.200000e+01 : f32
    %176 = vector.broadcast %cst_128 : f32 to vector<8x1xf32>
    %177 = arith.divf %175, %176 : vector<8x1xf32>
    %178 = vector.broadcast %170 : vector<8x1xf32> to vector<8x32xf32>
    %179 = arith.subf %162, %178 : vector<8x32xf32>
    %cst_129 = arith.constant 9.99999974E-6 : f32
    %180 = vector.broadcast %cst_129 : f32 to vector<8x1xf32>
    %181 = arith.addf %177, %180 : vector<8x1xf32>
    %182 = math.rsqrt %181 : vector<8x1xf32>
    %183 = vector.broadcast %182 : vector<8x1xf32> to vector<8x32xf32>
    %184 = arith.mulf %179, %183 : vector<8x32xf32>
    %185 = vector.broadcast %164 : vector<1x32xf32> to vector<8x32xf32>
    %186 = arith.mulf %184, %185 : vector<8x32xf32>
    %187 = vector.broadcast %166 : vector<1x32xf32> to vector<8x32xf32>
    %188 = arith.addf %186, %187 : vector<8x32xf32>
    %c1_130 = arith.constant 1 : index
    %c0_131 = arith.constant 0 : index
    %c0_132 = arith.constant 0 : index
    %189 = vector.load %arg12[%c1_130, %c0_131, %c0_132] : memref<2x32x64xf32, #tpu.memory_space<vmem>>, vector<1x32x64xf32>
    %190 = vector.shape_cast %189 : vector<1x32x64xf32> to vector<32x64xf32>
    %cst_133 = arith.constant dense<0.000000e+00> : vector<8x64xf32>
    %191 = tpu.matmul %188, %190, %cst_133 {dimension_numbers = #tpu.dot_dimension_numbers<[1], [0], [0], [1], [0, 0, 1, 1], [], []>} : vector<8x32xf32>, vector<32x64xf32>, vector<8x64xf32> -> vector<8x64xf32>
    %c1_134 = arith.constant 1 : index
    %c0_135 = arith.constant 0 : index
    %c0_136 = arith.constant 0 : index
    %192 = vector.load %arg13[%c1_134, %c0_135, %c0_136] : memref<2x1x64xf32, #tpu.memory_space<vmem>>, vector<1x1x64xf32>
    %193 = vector.shape_cast %192 : vector<1x1x64xf32> to vector<1x64xf32>
    %194 = vector.broadcast %193 : vector<1x64xf32> to vector<8x64xf32>
    %195 = arith.addf %191, %194 : vector<8x64xf32>
    %cst_137 = arith.constant 0.000000e+00 : f32
    %196 = vector.broadcast %cst_137 : f32 to vector<8x64xf32>
    %197 = arith.maximumf %195, %196 : vector<8x64xf32>
    %c1_138 = arith.constant 1 : index
    %c0_139 = arith.constant 0 : index
    %c0_140 = arith.constant 0 : index
    %198 = vector.load %arg14[%c1_138, %c0_139, %c0_140] : memref<2x64x32xf32, #tpu.memory_space<vmem>>, vector<1x64x32xf32>
    %199 = vector.shape_cast %198 : vector<1x64x32xf32> to vector<64x32xf32>
    %cst_141 = arith.constant dense<0.000000e+00> : vector<8x32xf32>
    %200 = tpu.matmul %197, %199, %cst_141 {dimension_numbers = #tpu.dot_dimension_numbers<[1], [0], [0], [1], [0, 0, 1, 1], [], []>} : vector<8x64xf32>, vector<64x32xf32>, vector<8x32xf32> -> vector<8x32xf32>
    %c1_142 = arith.constant 1 : index
    %c0_143 = arith.constant 0 : index
    %c0_144 = arith.constant 0 : index
    %201 = vector.load %arg15[%c1_142, %c0_143, %c0_144] : memref<2x1x32xf32, #tpu.memory_space<vmem>>, vector<1x1x32xf32>
    %202 = vector.shape_cast %201 : vector<1x1x32xf32> to vector<1x32xf32>
    %203 = vector.broadcast %202 : vector<1x32xf32> to vector<8x32xf32>
    %204 = arith.addf %200, %203 : vector<8x32xf32>
    %205 = arith.addf %188, %204 : vector<8x32xf32>
    %c1_145 = arith.constant 1 : index
    %c0_146 = arith.constant 0 : index
    %c0_147 = arith.constant 0 : index
    %206 = vector.load %arg16[%c1_145, %c0_146, %c0_147] : memref<2x1x32xf32, #tpu.memory_space<vmem>>, vector<1x1x32xf32>
    %207 = vector.shape_cast %206 : vector<1x1x32xf32> to vector<1x32xf32>
    %c1_148 = arith.constant 1 : index
    %c0_149 = arith.constant 0 : index
    %c0_150 = arith.constant 0 : index
    %208 = vector.load %arg17[%c1_148, %c0_149, %c0_150] : memref<2x1x32xf32, #tpu.memory_space<vmem>>, vector<1x1x32xf32>
    %209 = vector.shape_cast %208 : vector<1x1x32xf32> to vector<1x32xf32>
    %cst_151 = arith.constant dense<0.000000e+00> : vector<8xf32>
    %210 = vector.multi_reduction <add>, %205, %cst_151 [1] : vector<8x32xf32> to vector<8xf32>
    %211 = vector.shape_cast %210 : vector<8xf32> to vector<8x1xf32>
    %cst_152 = arith.constant 3.200000e+01 : f32
    %212 = vector.broadcast %cst_152 : f32 to vector<8x1xf32>
    %213 = arith.divf %211, %212 : vector<8x1xf32>
    %214 = vector.broadcast %213 : vector<8x1xf32> to vector<8x32xf32>
    %215 = arith.subf %205, %214 : vector<8x32xf32>
    %216 = arith.mulf %215, %215 : vector<8x32xf32>
    %cst_153 = arith.constant dense<0.000000e+00> : vector<8xf32>
    %217 = vector.multi_reduction <add>, %216, %cst_153 [1] : vector<8x32xf32> to vector<8xf32>
    %218 = vector.shape_cast %217 : vector<8xf32> to vector<8x1xf32>
    %cst_154 = arith.constant 3.200000e+01 : f32
    %219 = vector.broadcast %cst_154 : f32 to vector<8x1xf32>
    %220 = arith.divf %218, %219 : vector<8x1xf32>
    %221 = vector.broadcast %213 : vector<8x1xf32> to vector<8x32xf32>
    %222 = arith.subf %205, %221 : vector<8x32xf32>
    %cst_155 = arith.constant 9.99999974E-6 : f32
    %223 = vector.broadcast %cst_155 : f32 to vector<8x1xf32>
    %224 = arith.addf %220, %223 : vector<8x1xf32>
    %225 = math.rsqrt %224 : vector<8x1xf32>
    %226 = vector.broadcast %225 : vector<8x1xf32> to vector<8x32xf32>
    %227 = arith.mulf %222, %226 : vector<8x32xf32>
    %228 = vector.broadcast %207 : vector<1x32xf32> to vector<8x32xf32>
    %229 = arith.mulf %227, %228 : vector<8x32xf32>
    %230 = vector.broadcast %209 : vector<1x32xf32> to vector<8x32xf32>
    %231 = arith.addf %229, %230 : vector<8x32xf32>
    %c0_156 = arith.constant 0 : index
    %c0_157 = arith.constant 0 : index
    %c0_158 = arith.constant 0 : index
    %232 = vector.load %arg18[%c0_156, %c0_157, %c0_158] : memref<1x8x32xf32, #tpu.memory_space<vmem>>, vector<1x8x32xf32>
    %233 = vector.shape_cast %232 : vector<1x8x32xf32> to vector<8x32xf32>
    %234 = vector.shape_cast %231 : vector<8x32xf32> to vector<1x8x32xf32>
    tpu.vector_store %arg18[%c0_156, %c0_157, %c0_158], %234 {strides = array<i32>} : memref<1x8x32xf32, #tpu.memory_space<vmem>>, vector<1x8x32xf32>,
    return
  }
  func.func @transform_0(%arg0: i32) -> (i32, i32, i32) {
    %c0_i32 = arith.constant 0 : i32
    %c0_i32_0 = arith.constant 0 : i32
    %c0_i32_1 = arith.constant 0 : i32
    return %arg0, %c0_i32, %c0_i32_0 : i32, i32, i32
  }
  func.func @transform_1(%arg0: i32) -> (i32, i32, i32, i32) {
    %c0_i32 = arith.constant 0 : i32
    %c0_i32_0 = arith.constant 0 : i32
    %c0_i32_1 = arith.constant 0 : i32
    %c0_i32_2 = arith.constant 0 : i32
    %c0_i32_3 = arith.constant 0 : i32
    return %c0_i32, %c0_i32_0, %c0_i32_1, %c0_i32_2 : i32, i32, i32, i32
  }
  func.func @transform_2(%arg0: i32) -> (i32, i32, i32, i32) {
    %c0_i32 = arith.constant 0 : i32
    %c0_i32_0 = arith.constant 0 : i32
    %c0_i32_1 = arith.constant 0 : i32
    %c0_i32_2 = arith.constant 0 : i32
    %c0_i32_3 = arith.constant 0 : i32
    return %c0_i32, %c0_i32_0, %c0_i32_1, %c0_i32_2 : i32, i32, i32, i32
  }
  func.func @transform_3(%arg0: i32) -> (i32, i32, i32, i32) {
    %c0_i32 = arith.constant 0 : i32
    %c0_i32_0 = arith.constant 0 : i32
    %c0_i32_1 = arith.constant 0 : i32
    %c0_i32_2 = arith.constant 0 : i32
    %c0_i32_3 = arith.constant 0 : i32
    return %c0_i32, %c0_i32_0, %c0_i32_1, %c0_i32_2 : i32, i32, i32, i32
  }
  func.func @transform_4(%arg0: i32) -> (i32, i32, i32, i32) {
    %c0_i32 = arith.constant 0 : i32
    %c0_i32_0 = arith.constant 0 : i32
    %c0_i32_1 = arith.constant 0 : i32
    %c0_i32_2 = arith.constant 0 : i32
    %c0_i32_3 = arith.constant 0 : i32
    return %c0_i32, %c0_i32_0, %c0_i32_1, %c0_i32_2 : i32, i32, i32, i32
  }
  func.func @transform_5(%arg0: i32) -> (i32, i32, i32, i32) {
    %c0_i32 = arith.constant 0 : i32
    %c0_i32_0 = arith.constant 0 : i32
    %c0_i32_1 = arith.constant 0 : i32
    %c0_i32_2 = arith.constant 0 : i32
    %c0_i32_3 = arith.constant 0 : i32
    return %c0_i32, %c0_i32_0, %c0_i32_1, %c0_i32_2 : i32, i32, i32, i32
  }
  func.func @transform_6(%arg0: i32) -> (i32, i32, i32, i32) {
    %c0_i32 = arith.constant 0 : i32
    %c0_i32_0 = arith.constant 0 : i32
    %c0_i32_1 = arith.constant 0 : i32
    %c0_i32_2 = arith.constant 0 : i32
    %c0_i32_3 = arith.constant 0 : i32
    return %c0_i32, %c0_i32_0, %c0_i32_1, %c0_i32_2 : i32, i32, i32, i32
  }
  func.func @transform_7(%arg0: i32) -> (i32, i32, i32, i32) {
    %c0_i32 = arith.constant 0 : i32
    %c0_i32_0 = arith.constant 0 : i32
    %c0_i32_1 = arith.constant 0 : i32
    %c0_i32_2 = arith.constant 0 : i32
    %c0_i32_3 = arith.constant 0 : i32
    return %c0_i32, %c0_i32_0, %c0_i32_1, %c0_i32_2 : i32, i32, i32, i32
  }
  func.func @transform_8(%arg0: i32) -> (i32, i32, i32) {
    %c0_i32 = arith.constant 0 : i32
    %c0_i32_0 = arith.constant 0 : i32
    %c0_i32_1 = arith.constant 0 : i32
    %c0_i32_2 = arith.constant 0 : i32
    return %c0_i32, %c0_i32_0, %c0_i32_1 : i32, i32, i32
  }
  func.func @transform_9(%arg0: i32) -> (i32, i32, i32) {
    %c0_i32 = arith.constant 0 : i32
    %c0_i32_0 = arith.constant 0 : i32
    %c0_i32_1 = arith.constant 0 : i32
    %c0_i32_2 = arith.constant 0 : i32
    return %c0_i32, %c0_i32_0, %c0_i32_1 : i32, i32, i32
  }
  func.func @transform_10(%arg0: i32) -> (i32, i32, i32) {
    %c0_i32 = arith.constant 0 : i32
    %c0_i32_0 = arith.constant 0 : i32
    %c0_i32_1 = arith.constant 0 : i32
    %c0_i32_2 = arith.constant 0 : i32
    return %c0_i32, %c0_i32_0, %c0_i32_1 : i32, i32, i32
  }
  func.func @transform_11(%arg0: i32) -> (i32, i32, i32) {
    %c0_i32 = arith.constant 0 : i32
    %c0_i32_0 = arith.constant 0 : i32
    %c0_i32_1 = arith.constant 0 : i32
    %c0_i32_2 = arith.constant 0 : i32
    return %c0_i32, %c0_i32_0, %c0_i32_1 : i32, i32, i32
  }
  func.func @transform_12(%arg0: i32) -> (i32, i32, i32) {
    %c0_i32 = arith.constant 0 : i32
    %c0_i32_0 = arith.constant 0 : i32
    %c0_i32_1 = arith.constant 0 : i32
    %c0_i32_2 = arith.constant 0 : i32
    return %c0_i32, %c0_i32_0, %c0_i32_1 : i32, i32, i32
  }
  func.func @transform_13(%arg0: i32) -> (i32, i32, i32) {
    %c0_i32 = arith.constant 0 : i32
    %c0_i32_0 = arith.constant 0 : i32
    %c0_i32_1 = arith.constant 0 : i32
    %c0_i32_2 = arith.constant 0 : i32
    return %c0_i32, %c0_i32_0, %c0_i32_1 : i32, i32, i32
  }
  func.func @transform_14(%arg0: i32) -> (i32, i32, i32) {
    %c0_i32 = arith.constant 0 : i32
    %c0_i32_0 = arith.constant 0 : i32
    %c0_i32_1 = arith.constant 0 : i32
    %c0_i32_2 = arith.constant 0 : i32
    return %c0_i32, %c0_i32_0, %c0_i32_1 : i32, i32, i32
  }
  func.func @transform_15(%arg0: i32) -> (i32, i32, i32) {
    %c0_i32 = arith.constant 0 : i32
    %c0_i32_0 = arith.constant 0 : i32
    %c0_i32_1 = arith.constant 0 : i32
    %c0_i32_2 = arith.constant 0 : i32
    return %c0_i32, %c0_i32_0, %c0_i32_1 : i32, i32, i32
  }
  func.func @transform_16(%arg0: i32) -> (i32, i32, i32) {
    %c0_i32 = arith.constant 0 : i32
    %c0_i32_0 = arith.constant 0 : i32
    %c0_i32_1 = arith.constant 0 : i32
    %c0_i32_2 = arith.constant 0 : i32
    return %c0_i32, %c0_i32_0, %c0_i32_1 : i32, i32, i32
  }
  func.func @transform_17(%arg0: i32) -> (i32, i32, i32) {
    %c0_i32 = arith.constant 0 : i32
    %c0_i32_0 = arith.constant 0 : i32
    %c0_i32_1 = arith.constant 0 : i32
    return %arg0, %c0_i32, %c0_i32_0 : i32, i32, i32
  }
}

</mosaic_0001>

<bundles_post_ra>
// kernel: tpu_custom_call.1
= control target key start
LH: loop header
LB: loop body
LE: loop exit
PB: predicated region body
PF: predicated region fallthrough
CT: control target
= control target key end

     0   :  { %s7137_s0 = inlined_call_operand.vmem [shape: f32[2,8,32], index: 0, kind: input, shape index: {}]   ;;  %s7138_s1 = inlined_call_operand.vmem [shape: f32[2,4,32,8], index: 1, kind: input, shape index: {}]   ;;  %s7139_s2 = inlined_call_operand.vmem [shape: f32[2,4,1,8], index: 2, kind: input, shape index: {}]   ;;  %s7140_s3 = inlined_call_operand.vmem [shape: f32[2,4,32,8], index: 3, kind: input, shape index: {}]   ;;  %s7141_s4 = inlined_call_operand.vmem [shape: f32[2,4,1,8], index: 4, kind: input, shape index: {}]   ;;  %s7142_s5 = inlined_call_operand.vmem [shape: f32[2,4,32,8], index: 5, kind: input, shape index: {}]   ;;  %s7143_s6 = inlined_call_operand.vmem [shape: f32[2,4,1,8], index: 6, kind: input, shape index: {}]   ;;  %s7144_s7 = inlined_call_operand.vmem [shape: f32[2,4,8,32], index: 7, kind: input, shape index: {}]   ;;  %s7145_s8 = inlined_call_operand.vmem [shape: f32[2,1,32], index: 8, kind: input, shape index: {}]   ;;  %s7146_s9 = inlined_call_operand.vmem [shape: f32[2,1,32], index: 9, kind: input, shape index: {}]   ;;  %s7147_s10 = inlined_call_operand.vmem [shape: f32[2,1,32], index: 10, kind: input, shape index: {}]   ;;  %s7148_s11 = inlined_call_operand.vmem [shape: f32[2,32,64], index: 11, kind: input, shape index: {}]   ;;  %s7149_s12 = inlined_call_operand.vmem [shape: f32[2,1,64], index: 12, kind: input, shape index: {}]   ;;  %s7150_s13 = inlined_call_operand.vmem [shape: f32[2,64,32], index: 13, kind: input, shape index: {}]   ;;  %s7151_s14 = inlined_call_operand.vmem [shape: f32[2,1,32], index: 14, kind: input, shape index: {}]   ;;  %s7152_s15 = inlined_call_operand.vmem [shape: f32[2,1,32], index: 15, kind: input, shape index: {}]   ;;  %s7153_s16 = inlined_call_operand.vmem [shape: f32[2,1,32], index: 16, kind: input, shape index: {}]   ;;  %s7154_s17 = inlined_call_operand.hbm [shape: f32[2,8,32], index: 17, kind: output, shape index: {}]  }
   0x1   :  { %7165 = sst [smem:[#allocation12_spill]] %s7137_s0 }
   0x2   :  { %7166 = sst [smem:[#allocation13_spill]] %s7138_s1 }
   0x3   :  { %7167 = sst [smem:[#allocation14_spill]] %s7139_s2 }
   0x4   :  { %7168 = sst [smem:[#allocation15_spill]] %s7154_s17 }
   0x5   :  { %22 = vsyncpa [#allocation3], 0 }
   0x6   :  { %24 = vsyncpa [#allocation3 + $0x1], 0  ;;  %s6216_s24 = smov 0   ;;  %s6218_s25 = smov 0  }
   0x7   :  { %s6220_s26 = smov 0   ;;  %s6222_s27 = smov 0  }
   0x8 LB: > { %7169 = sst [smem:[#allocation5_spill]] %s6108_s24  ;;  %s6237_s28 = sadd.s32 4294967295, %s6120_s27   ;;  %s6120_s27 = sphi %s6222_s27, %s7186_s27   ;;  %s6116_s26 = sphi %s6220_s26, %s7188_s26   ;;  %s6112_s25 = sphi %s6218_s25, %s7190_s25   ;;  %s6108_s24 = sphi %s6216_s24, %s7189_s24  }
   0x9   : > { %7170 = sst [smem:[#allocation6_spill]] %s6116_s26  ;;  %s4965_s29 = sadd.s32 4294967294, %s6120_s27  }
   0xa   : > { %7171 = sst [smem:[#allocation7_spill]] %s6120_s27  ;;  %s6241_s0 = sadd.s32 1, %s6120_s27  }
   0xb   : > { %7172 = sst [smem:[#allocation8_spill]] %s6241_s0  ;;  %s399_s30 = sadd.s32 1, %s6116_s26 }
   0xc   : > { %s396_s18 = ssub.s32 %s6120_s27, %s6241_s0  ;;  %p409_p0 = scmp.ne.s32.totalorder %s6116_s26, %s6112_s25 }
   0xd   : > { %p397_p1 = scmp.eq.s32.totalorder %s396_s18, 0  ;;  %p410_p2 = scmp.eq.s32.totalorder %s6237_s28, 1 }
   0xe   : > { %p415_p3 = scmp.ne.s32.totalorder %s6112_s25, %s6108_s24  ;;  %p416_p4 = scmp.eq.s32.totalorder %s4965_s29, 1 }
   0xf   : > { %s6252_s19 = scalar_select %p397_p1, %s6116_s26, %s399_s30  }
  0x10   : > { %p6254_p5 = por %p410_p2, %p409_p0  ;;  %p6258_p6 = por %p416_p4, %p415_p3 }
  0x11   : > { %7173 = sst [smem:[#allocation9_spill]] %s6252_s19  ;;  %p4968_p7 = scmp.ge.s32.totalorder %s6120_s27, 1 }
  0x12   : > { %s7174_s1 = scalar_select %p6254_p5, 1, 0 }
  0x13   : > { %s7176_s20 = scalar_select %p6258_p6, 1, 0 }
  0x14   : > { %7175 = sst [smem:[#allocation10_spill]] %s7174_s1  ;;  %p489_p8 = scmp.lt.s32.totalorder %s6120_s27, 3 }
  0x15   : > { %7177 = sst [smem:[#allocation11_spill]] %s7176_s20 }
  0x16   : > { %p490_p9 = pnand %p4968_p7, %p489_p8 }
  0x17   : > { %s7178_s23 = sld [smem:[#allocation13_spill]] (!%p490_p9)  ;;  %v6122_v3 = vmov (!%p490_p9), 0.0|0.0   ;;  %p540_p10 = scmp.lt.s32.totalorder (!%p490_p9), %s6237_s28, 1  ;;  %vm6123_vm0 = vmmov (!%p490_p9), 0   ;;  %v6124_v11 = vmov (!%p490_p9), 0.0   ;;  %vm589_vm1 = vcmask (!%p490_p9), 261120  }
  0x18   : > { %493 = sbr.rel (%p490_p9) target bundleno = 4581 (0x11e5), region = 88  ;;  %5796 = vmatprep.subr.bf16.mxu0 (!%p490_p9), %v6122_v3  ;;  %5802 = vmatprep.subr.bf16.mxu1 (!%p490_p9), %v6122_v3  ;;  %s7179_s1 = sld [smem:[#allocation12_spill]] (!%p490_p9)  ;;  %v873_v27 = vld [vmem:[%s7140_s3] sm:$0xff] (!%p490_p9)  ;;  %v874_v28 = vld [vmem:[%s7140_s3 + $0x8] sm:$0xff] (!%p490_p9)  ;;  %v875_v33 = vld [vmem:[%s7140_s3 + $0x10] sm:$0xff] (!%p490_p9)  ;;  %vm1521_vm2 = vcmask (!%p490_p9), 64512  }
  0x19   : > { %5360 = vmatprep.mubr.msk.f32.mxu0 (!%p490_p9), %vm6123_vm0, %v6124_v11  ;;  %5371 = vmatprep.mubr.msk.f32.mxu1 (!%p490_p9), %vm6123_vm0, %v6124_v11  ;;  %v877_v29 = vld [vmem:[%s7140_s3 + $0x20] sm:$0xff] (!%p490_p9)  ;;  %v878_v30 = vld [vmem:[%s7140_s3 + $0x28] sm:$0xff] (!%p490_p9)  ;;  %v5821_v31 = vpack.c.bf16 (!%p490_p9), %v874_v28, %v873_v27  ;;  %v876_v34 = vld [vmem:[%s7140_s3 + $0x18] sm:$0xff] (!%p490_p9)  ;;  %s7180_s2 = sld [smem:[#allocation14_spill]] (!%p490_p9)  ;;  %vm2608_vm3 = vcmask (!%p490_p9), 523264   ;;  %s537_s27 = sand.u32 (!%p490_p9), 1, %s6112_s25  }
  0x1a   : > { %v5827_v32 = vpack.c.bf16 (!%p490_p9), %v878_v30, %v877_v29  ;;  %v879_v35 = vld [vmem:[%s7140_s3 + $0x30] sm:$0xff] (!%p490_p9)  ;;  %v880_v36 = vld [vmem:[%s7140_s3 + $0x38] sm:$0xff] (!%p490_p9)  ;;  %v5824_v37 = vpack.c.bf16 (!%p490_p9), %v876_v34, %v875_v33  ;;  %v881_v39 = vld [vmem:[%s7140_s3 + $0x40] sm:$0xff] (!%p490_p9)  ;;  %s7182_s17 = sld [smem:[#allocation15_spill]] (!%p490_p9)  ;;  %s4893_s29 = scalar_lea.sflag (!%p490_p9), [#allocation3], %s537_s27 }
  0x1b   : > { %v5830_v38 = vpack.c.bf16 (!%p490_p9), %v880_v36, %v879_v35  ;;  %v882_v40 = vld [vmem:[%s7140_s3 + $0x48] sm:$0xff] (!%p490_p9)  ;;  %v885_v41 = vld [vmem:[%s7140_s3 + $0x60] sm:$0xff] (!%p490_p9)  ;;  %v883_v45 = vld [vmem:[%s7140_s3 + $0x50] sm:$0xff] (!%p490_p9) }
  0x1c   : > { %v886_v42 = vld [vmem:[%s7140_s3 + $0x68] sm:$0xff] (!%p490_p9)  ;;  %v5833_v43 = vpack.c.bf16 (!%p490_p9), %v882_v40, %v881_v39  ;;  %v884_v46 = vld [vmem:[%s7140_s3 + $0x58] sm:$0xff] (!%p490_p9)  ;;  %v887_v47 = vld [vmem:[%s7140_s3 + $0x70] sm:$0xff] (!%p490_p9) }
  0x1d   : > { %v545_v0 = vld [vmem:[%s7178_s23] sm:$0xff] (!%p490_p9)  ;;  %v546_v1 = vld [vmem:[%s7178_s23 + $0x8] sm:$0xff] (!%p490_p9)  ;;  %v547_v6 = vld [vmem:[%s7178_s23 + $0x10] sm:$0xff] (!%p490_p9)  ;;  %v5839_v44 = vpack.c.bf16 (!%p490_p9), %v886_v42, %v885_v41  ;;  %v5836_v49 = vpack.c.bf16 (!%p490_p9), %v884_v46, %v883_v45 }
  0x1e   : > { %v549_v2 = vld [vmem:[%s7178_s23 + $0x20] sm:$0xff] (!%p490_p9)  ;;  %v5797_v4 = vpack.c.bf16 (!%p490_p9), %v546_v1, %v545_v0  ;;  %v550_v5 = vld [vmem:[%s7178_s23 + $0x28] sm:$0xff] (!%p490_p9)  ;;  %v548_v7 = vld [vmem:[%s7178_s23 + $0x18] sm:$0xff] (!%p490_p9) }
  0x1f   : > { %v5803_v8 = vpack.c.bf16 %v550_v5, %v549_v2  ;;  %v551_v9 = vld [vmem:[%s7178_s23 + $0x30] sm:$0xff]  ;;  %v552_v10 = vld [vmem:[%s7178_s23 + $0x38] sm:$0xff]  ;;  %v5800_v12 = vpack.c.bf16 %v548_v7, %v547_v6  ;;  %s541_s26 = scalar_select %p540_p10, %s6237_s28, 1  ;;  %v553_v14 = vld [vmem:[%s7178_s23 + $0x40] sm:$0xff] }
  0x20   : > { %5798 = vmatpush3.bf16.msra.mxu0 %v5797_v4  ;;  %v5806_v13 = vpack.c.bf16 %v552_v10, %v551_v9  ;;  %v554_v15 = vld [vmem:[%s7178_s23 + $0x48] sm:$0xff]  ;;  %v557_v16 = vld [vmem:[%s7178_s23 + $0x60] sm:$0xff]  ;;  %v555_v21 = vld [vmem:[%s7178_s23 + $0x50] sm:$0xff] }
  0x21   : > { %5804 = vmatpush3.bf16.msra.mxu1 %v5803_v8  ;;  %5799 = vmatprep.subr.bf16.mxu0 %v6122_v3  ;;  %s4970_s22 = sshll.u32 %s541_s26, 3  ;;  %v558_v17 = vld [vmem:[%s7178_s23 + $0x68] sm:$0xff]  ;;  %v5809_v19 = vpack.c.bf16 %v554_v15, %v553_v14  ;;  %v556_v22 = vld [vmem:[%s7178_s23 + $0x58] sm:$0xff]  ;;  %v559_v23 = vld [vmem:[%s7178_s23 + $0x70] sm:$0xff] }
  0x22   : > { %5805 = vmatprep.subr.bf16.mxu1 %v6122_v3  ;;  %s543_s0 = scalar_lea.vmem %s7179_s1, %s4970_s22  ;;  %v5815_v20 = vpack.c.bf16 %v558_v17, %v557_v16  ;;  %v560_v24 = vld [vmem:[%s7178_s23 + $0x78] sm:$0xff]  ;;  %v5812_v25 = vpack.c.bf16 %v556_v22, %v555_v21  ;;  %v1197_v51 = vld [vmem:[%s7142_s5] sm:$0xff]  ;;  %v1198_v52 = vld [vmem:[%s7142_s5 + $0x8] sm:$0xff]  ;;  %s4969_s1 = sshll.u32 %s537_s27, 3 }
  0x23   : > { %v6313_v18 = vld [vmem:[%s543_s0] sm:$0xff]  ;;  %v5818_v26 = vpack.c.bf16 %v560_v24, %v559_v23  ;;  %v888_v48 = vld [vmem:[%s7140_s3 + $0x78] sm:$0xff]  ;;  %v5845_v53 = vpack.c.bf16 %v1198_v52, %v1197_v51  ;;  %v1199_v54 = vld [vmem:[%s7142_s5 + $0x10] sm:$0xff]  ;;  %s5153_s0 = sshll.u32 %s6237_s28, 7  ;;  %s539_s26 = scalar_lea.vmem [#allocation2], %s4969_s1 }
  0x24   : > { %5801 = vmatpush3.bf16.msra.mxu0 %v5800_v12  ;;  %v5842_v50 = vpack.c.bf16 %v888_v48, %v887_v47  ;;  %v1200_v55 = vld [vmem:[%s7142_s5 + $0x18] sm:$0xff]  ;;  %v1201_v57 = vld [vmem:[%s7142_s5 + $0x20] sm:$0xff]  ;;  %v1202_v58 = vld [vmem:[%s7142_s5 + $0x28] sm:$0xff]  ;;  %s4906_s21 = sshll.u32 %s539_s26, 4  ;;  %s6125_s28 = smov [#allocation2]   ;;  %s7096_s21 = int_to_ptr.vmem [resolvable:$true] %s4906_s21 }
  0x25   : > { %5807 = vmatpush3.bf16.msra.mxu1 %v5806_v13  ;;  %5808 = vmatprep.subr.bf16.mxu0 %v6122_v3  ;;  %v5848_v56 = vpack.c.bf16 %v1200_v55, %v1199_v54  ;;  %v1205_v59 = vld [vmem:[%s7142_s5 + $0x40] sm:$0xff]  ;;  %v5851_v60 = vpack.c.bf16 %v1202_v58, %v1201_v57  ;;  %v1206_v61 = vld [vmem:[%s7142_s5 + $0x48] sm:$0xff]  ;;  %v1203_v63 = vld [vmem:[%s7142_s5 + $0x30] sm:$0xff]  ;;  %s6058_s30 = scalar_lea.vmem %s7096_s21, 128  ;;  %s6062_s1 = sshll.u32 %s6125_s28, 4  ;;  %s6063_s1 = int_to_ptr.vmem [resolvable:$false] %s6062_s1 }
  0x26   : > { %5814 = vmatprep.subr.bf16.mxu1 %v6122_v3  ;;  %v5857_v62 = vpack.c.bf16 %v1206_v61, %v1205_v59  ;;  %v1204_v0 = vld [vmem:[%s7142_s5 + $0x38] sm:$0xff]  ;;  %v1207_v1 = vld [vmem:[%s7142_s5 + $0x50] sm:$0xff]  ;;  %v1209_v6 = vld [vmem:[%s7142_s5 + $0x60] sm:$0xff]  ;;  %p6059_p11 = scmp.ne.s32.totalorder %s7096_s21, %s6058_s30  ;;  %s6064_s19 = scalar_lea.vmem %s6063_s1, 256 }
  0x27   : > { %5361 = vmatmul.mubr.msk.f32.vlgmr.msra.gmra.mrb[0].mxu0 %vm589_vm1, %v6313_v18  ;;  %v5854_v2 = vpack.c.bf16 %v1204_v0, %v1203_v63  ;;  %v1208_v4 = vld [vmem:[%s7142_s5 + $0x58] sm:$0xff]  ;;  %v1210_v7 = vld [vmem:[%s7142_s5 + $0x68] sm:$0xff]  ;;  %v1211_v9 = vld [vmem:[%s7142_s5 + $0x70] sm:$0xff]  ;;  %p6065_p0 = scmp.lt.s32.totalorder %s7096_s21, %s6063_s1  ;;  %p6066_p1 = scmp.lt.s32.totalorder %s6064_s19, %s6058_s30 }
  0x28   : > { %5372 = vmatmul.mubr.msk.f32.vlgmr.msra.gmra.mrb[0].mxu1 %vm589_vm1, %v6313_v18  ;;  %5810 = vmatpush3.bf16.msra.mxu0 %v5809_v19  ;;  %v5860_v5 = vpack.c.bf16 %v1208_v4, %v1207_v1  ;;  %v5863_v8 = vpack.c.bf16 %v1210_v7, %v1209_v6  ;;  %v1212_v10 = vld [vmem:[%s7142_s5 + $0x78] sm:$0xff]  ;;  %v4979_v22 = vld [vmem:[%s7141_s4] ss:$0 sm:$0xff]  ;;  %v4980_v24 = vld [vmem:[%s7141_s4 + $0x1] ss:$0 sm:$0xff]  ;;  %p6060_p12 = pnand %p6059_p11, %p6254_p5 }
  0x29   : > { %5816 = vmatpush3.bf16.msra.mxu1 %v5815_v20  ;;  %5811 = vmatprep.subr.bf16.mxu0 %v6122_v3  ;;  %v5866_v12 = vpack.c.bf16 %v1212_v10, %v1211_v9  ;;  %v4981_v33 = vld [vmem:[%s7141_s4 + $0x2] ss:$0 sm:$0xff]  ;;  %v4982_v34 = vld [vmem:[%s7141_s4 + $0x3] ss:$0 sm:$0xff]  ;;  %v4987_v46 = vld [vmem:[%s7143_s6] ss:$0 sm:$0xff]  ;;  %p6067_p2 = por %p6066_p1, %p6065_p0 }
  0x2a   : > { %5817 = vmatprep.subr.bf16.mxu1 %v6122_v3  ;;  %5382 = vmatprep.mubr.msk.f32.mxu0 %vm6123_vm0, %v6124_v11  ;;  %v4974_v41 = vld [vmem:[%s7180_s2 + $0x3] ss:$0 sm:$0xff]  ;;  %p6061_p13 = pneg %p6060_p12 }
  0x2b   : > { %5393 = vmatprep.mubr.msk.f32.mxu1 %vm6123_vm0, %v6124_v11 }
  0x2c   : > { %5813 = vmatpush3.bf16.msra.mxu0 %v5812_v25  ;;  %v4971_v25 = vld [vmem:[%s7180_s2] ss:$0 sm:$0xff]  ;;  %p6068_p3 = pnand %p6067_p2, %p6061_p13 }
  0x2d   : > { %5819 = vmatpush3.bf16.msra.mxu1 %v5818_v26  ;;  %5820 = vmatprep.subr.bf16.mxu0 %v6122_v3 }
  0x2e   : > { %5826 = vmatprep.subr.bf16.mxu1 %v6122_v3 }
  0x2f   : > { %5383 = vmatmul.mubr.msk.f32.vlgmr.msra.gmra.mrb[2].mxu0 %vm589_vm1, %v6313_v18 }
  0x30   : > { %5394 = vmatmul.mubr.msk.f32.vlgmr.msra.gmra.mrb[2].mxu1 %vm589_vm1, %v6313_v18  ;;  %5822 = vmatpush3.bf16.msra.mxu0 %v5821_v31 }
  0x31   : > { %5828 = vmatpush3.bf16.msra.mxu1 %v5827_v32  ;;  %5823 = vmatprep.subr.bf16.mxu0 %v6122_v3  ;;  %v4972_v32 = vld [vmem:[%s7180_s2 + $0x1] ss:$0 sm:$0xff] }
  0x32   : > { %5829 = vmatprep.subr.bf16.mxu1 %v6122_v3  ;;  %5404 = vmatprep.mubr.msk.f32.mxu0 %vm6123_vm0, %v6124_v11 }
  0x33   : > { %5415 = vmatprep.mubr.msk.f32.mxu1 %vm6123_vm0, %v6124_v11 }
  0x34   : > { %5825 = vmatpush3.bf16.msra.mxu0 %v5824_v37  ;;  %v4973_v37 = vld [vmem:[%s7180_s2 + $0x2] ss:$0 sm:$0xff] }
  0x35   : > { %5831 = vmatpush3.bf16.msra.mxu1 %v5830_v38  ;;  %5832 = vmatprep.subr.bf16.mxu0 %v6122_v3 }
  0x36   : > { %5838 = vmatprep.subr.bf16.mxu1 %v6122_v3 }
  0x37   : > { %5405 = vmatmul.mubr.msk.f32.vlgmr.msra.gmra.mrb[4].mxu0 %vm589_vm1, %v6313_v18 }
  0x38   : > { %5416 = vmatmul.mubr.msk.f32.vlgmr.msra.gmra.mrb[4].mxu1 %vm589_vm1, %v6313_v18  ;;  %5834 = vmatpush3.bf16.msra.mxu0 %v5833_v43 }
  0x39   : > { %5840 = vmatpush3.bf16.msra.mxu1 %v5839_v44  ;;  %5835 = vmatprep.subr.bf16.mxu0 %v6122_v3 }
  0x3a   : > { %5841 = vmatprep.subr.bf16.mxu1 %v6122_v3  ;;  %5426 = vmatprep.mubr.msk.f32.mxu0 %vm6123_vm0, %v6124_v11 }
  0x3b   : > { %5437 = vmatprep.mubr.msk.f32.mxu1 %vm6123_vm0, %v6124_v11 }
  0x3c   : > { %5837 = vmatpush3.bf16.msra.mxu0 %v5836_v49 }
  0x3d   : > { %5843 = vmatpush3.bf16.msra.mxu1 %v5842_v50  ;;  %5844 = vmatprep.subr.bf16.mxu0 %v6122_v3  ;;  %v4988_v50 = vld [vmem:[%s7143_s6 + $0x1] ss:$0 sm:$0xff] }
  0x3e   : > { %5850 = vmatprep.subr.bf16.mxu1 %v6122_v3 }
  0x3f   : > { %5427 = vmatmul.mubr.msk.f32.vlgmr.msra.gmra.mrb[6].mxu0 %vm589_vm1, %v6313_v18 }
  0x40   : > { %5438 = vmatmul.mubr.msk.f32.vlgmr.msra.gmra.mrb[6].mxu1 %vm589_vm1, %v6313_v18  ;;  %5846 = vmatpush3.bf16.msra.mxu0 %v5845_v53 }
  0x41   : > { %5847 = vmatprep.subr.bf16.mxu0 %v6122_v3  ;;  %5448 = vmatprep.mubr.msk.f32.mxu0 %vm6123_vm0, %v6124_v11 }
  0x42   : > { %5459 = vmatprep.mubr.msk.f32.mxu1 %vm6123_vm0, %v6124_v11  ;;  %5852 = vmatpush3.bf16.msra.mxu1 %v5851_v60 }
  0x43   : > { %5853 = vmatprep.subr.bf16.mxu1 %v6122_v3 }
  0x44   : > { %5849 = vmatpush3.bf16.msra.mxu0 %v5848_v56 }
  0x45   : > { %5856 = vmatprep.subr.bf16.mxu0 %v6122_v3 }
  0x46   : > { %5855 = vmatpush3.bf16.msra.mxu1 %v5854_v2 }
  0x47   : > { %5449 = vmatmul.mubr.msk.f32.vlgmr.msra.gmra.mrb[8].mxu0 %vm589_vm1, %v6313_v18  ;;  %5862 = vmatprep.subr.bf16.mxu1 %v6122_v3 }
  0x48   : > { %5858 = vmatpush3.bf16.msra.mxu0 %v5857_v62  ;;  %5470 = vmatprep.mubr.msk.f32.mxu0 %vm6123_vm0, %v6124_v11 }
  0x49   : > { %5859 = vmatprep.subr.bf16.mxu0 %v6122_v3  ;;  %5460 = vmatmul.mubr.msk.f32.vlgmr.msra.gmra.mrb[8].mxu1 %vm589_vm1, %v6313_v18 }
  0x4a   : > { %5864 = vmatpush3.bf16.msra.mxu1 %v5863_v8  ;;  %5481 = vmatprep.mubr.msk.f32.mxu1 %vm6123_vm0, %v6124_v11 }
  0x4b   : > { %5865 = vmatprep.subr.bf16.mxu1 %v6122_v3 }
  0x4c   : > { %5861 = vmatpush3.bf16.msra.mxu0 %v5860_v5 }
  0x4d   : > { %5484 = vmatprep.subr.mxu0 %v6124_v11 }
  0x4e   : > { %5867 = vmatpush3.bf16.msra.mxu1 %v5866_v12 }
  0x4f   : > { %5471 = vmatmul.mubr.msk.f32.vlgmr.msra.gmra.mrb[10].mxu0 %vm589_vm1, %v6313_v18  ;;  %5499 = vmatprep.subr.mxu1 %v6124_v11 }
  0x50   : > { %5486 = vmatprep.mubr.msk.f32.mxu0 %vm6123_vm0, %v6124_v11 }
  0x51   : > { %5482 = vmatmul.mubr.msk.f32.vlgmr.msra.gmra.mrb[10].mxu1 %vm589_vm1, %v6313_v18 }
  0x52   : > { %5501 = vmatprep.mubr.msk.f32.mxu1 %vm6123_vm0, %v6124_v11 }
  0xfa   : > { %v659_v13 = vpop.f32.mrb[0].mxu0 }
  0xfb   : > { %v5362_v14 = vpop.f32.mrb[1].mxu0  ;;  %v729_v15 = vpop.f32.mrb[0].mxu1  ;;  %v660_v31 = vadd.f32 %v4971_v25, %v659_v13 }
  0xfc   : > { %v5373_v16 = vpop.f32.mrb[1].mxu1  ;;  %v730_v35 = vadd.f32 %v4972_v32, %v729_v15 }
 0x102   : > { %v799_v17 = vpop.f32.mrb[2].mxu0 }
 0x103   : > { %v5384_v19 = vpop.f32.mrb[3].mxu0  ;;  %v869_v20 = vpop.f32.mrb[2].mxu1  ;;  %v800_v44 = vadd.f32 %v4973_v37, %v799_v17 }
 0x104   : > { %v5395_v21 = vpop.f32.mrb[3].mxu1  ;;  %v870_v45 = vadd.f32 %v4974_v41, %v869_v20  ;;  %v4990_v41 = vld [vmem:[%s7143_s6 + $0x3] ss:$0 sm:$0xff] }
 0x10a   : > { %v983_v23 = vpop.f32.mrb[4].mxu0 }
 0x10b   : > { %v984_v26 = vadd.f32 %v4979_v22, %v983_v23  ;;  %v5406_v27 = vpop.f32.mrb[5].mxu0  ;;  %v1053_v28 = vpop.f32.mrb[4].mxu1 }
 0x10c   : > { %v5417_v29 = vpop.f32.mrb[5].mxu1  ;;  %v1054_v30 = vadd.f32 %v4980_v24, %v1053_v28 }
 0x10d   : > { %5485 = vmatpush3.xpose.msk.msra.mxu0 %vm1521_vm2, %v984_v26 }
 0x10e   : > { %5489 = vmatprep.subr.mxu0 %v6124_v11 }
 0x110   : > { %5487 = vmatmul.mubr.msk.f32.vlgmr.msra.gmra.mrb[12].mxu0 %vm1521_vm2, %v660_v31 }
 0x111   : > { %5490 = vmatpush3.xpose.msk.msra.mxu0 %vm1521_vm2, %v1054_v30  ;;  %5491 = vmatprep.mubr.msk.f32.mxu0 %vm6123_vm0, %v6124_v11 }
 0x112   : > { %v1123_v36 = vpop.f32.mrb[6].mxu0  ;;  %5494 = vmatprep.subr.mxu0 %v6124_v11 }
 0x113   : > { %v1124_v38 = vadd.f32 %v4981_v33, %v1123_v36  ;;  %v1193_v39 = vpop.f32.mrb[6].mxu1  ;;  %v5428_v40 = vpop.f32.mrb[7].mxu0  ;;  %v4989_v36 = vld [vmem:[%s7143_s6 + $0x2] ss:$0 sm:$0xff] }
 0x114   : > { %v1194_v42 = vadd.f32 %v4982_v34, %v1193_v39  ;;  %5492 = vmatmul.mubr.msk.f32.vlgmr.msra.gmra.mrb[14].mxu0 %vm1521_vm2, %v730_v35  ;;  %v5439_v43 = vpop.f32.mrb[7].mxu1 }
 0x115   : > { %5495 = vmatpush3.xpose.msk.msra.mxu0 %vm1521_vm2, %v1124_v38  ;;  %5496 = vmatprep.mubr.msk.f32.mxu0 %vm6123_vm0, %v6124_v11 }
 0x116   : > { %5500 = vmatpush3.xpose.msk.msra.mxu1 %vm1521_vm2, %v1194_v42  ;;  %5504 = vmatprep.subr.mxu0 %v6124_v11 }
 0x117   : > { %5509 = vmatprep.subr.mxu1 %v6124_v11 }
 0x118   : > { %5497 = vmatmul.mubr.msk.f32.vlgmr.msra.gmra.mrb[16].mxu0 %vm1521_vm2, %v800_v44 }
 0x119   : > { %5502 = vmatmul.mubr.msk.f32.vlgmr.msra.gmra.mrb[12].mxu1 %vm1521_vm2, %v870_v45  ;;  %5506 = vmatprep.mubr.msk.f32.mxu0 %vm6123_vm0, %v6124_v11 }
 0x11a   : > { %5511 = vmatprep.mubr.msk.f32.mxu1 %vm6123_vm0, %v6124_v11  ;;  %v1307_v47 = vpop.f32.mrb[8].mxu0 }
 0x11b   : > { %v1308_v48 = vadd.f32 %v4987_v46, %v1307_v47  ;;  %v5450_v49 = vpop.f32.mrb[9].mxu0 }
 0x11c   : > { %v1377_v51 = vpop.f32.mrb[8].mxu1  ;;  %v2166_v49 = vld [vmem:[%s7144_s7] sm:$0xff] }
 0x11d   : > { %5505 = vmatpush3.msra.mxu0 %v1308_v48  ;;  %v1378_v52 = vadd.f32 %v4988_v50, %v1377_v51  ;;  %v5461_v54 = vpop.f32.mrb[9].mxu1  ;;  %v2167_v50 = vld [vmem:[%s7144_s7 + $0x8] sm:$0xff]  ;;  %v2168_v51 = vld [vmem:[%s7144_s7 + $0x10] sm:$0xff] }
 0x11e   : > { %5514 = vmatprep.subr.mxu0 %v6124_v11  ;;  %v2169_v54 = vld [vmem:[%s7144_s7 + $0x18] sm:$0xff] }
 0x11f   : > { %5510 = vmatpush3.msra.mxu1 %v1378_v52 }
 0x120   : > { %5519 = vmatprep.subr.mxu1 %v6124_v11 }
 0x122   : > { %v6544_v53 = vpop.f32.mrb[10].mxu0 }
 0x123   : > { %v5472_v55 = vpop.f32.mrb[11].mxu0  ;;  %v1448_v40 = vadd.f32 %v4989_v36, %v6544_v53  ;;  %v2598_v36 = vld [vmem:[%s7150_s13 + $0x28] sm:$0xff] }
 0x124   : > { %v6547_v56 = vpop.f32.mrb[10].mxu1 }
 0x125   : > { %v5483_v57 = vpop.f32.mrb[11].mxu1  ;;  %v1518_v44 = vadd.f32 %v4990_v41, %v6547_v56 }
 0x1e3   : > { %v1594_v58 = vpop.f32.mrb[12].mxu0 }
 0x1e4   : > { %v1826_v59 = vmul.f32 0.35355338, %v1594_v58  ;;  %v5488_v60 = vpop.f32.mrb[13].mxu0 }
 0x1e6   : > { %v1830_v61 = vsel %vm1521_vm2, %v1826_v59, -inf }
 0x1e7   : > { %1831 = vmax.xlane.f32.xlu0 %v1830_v61  ;;  %v1670_v62 = vpop.f32.mrb[14].mxu0 }
 0x1e8   : > { %v1827_v63 = vmul.f32 0.35355338, %v1670_v62  ;;  %v5493_v0 = vpop.f32.mrb[15].mxu0 }
 0x1ea   : > { %v1833_v1 = vsel %vm1521_vm2, %v1827_v63, -inf }
 0x1eb   : > { %1834 = vmax.xlane.f32.xlu0 %v1833_v1  ;;  %v1746_v2 = vpop.f32.mrb[16].mxu0 }
 0x1ec   : > { %v1822_v4 = vpop.f32.mrb[12].mxu1  ;;  %v1828_v5 = vmul.f32 0.35355338, %v1746_v2  ;;  %v5498_v6 = vpop.f32.mrb[17].mxu0 }
 0x1ed   : > { %v5503_v7 = vpop.f32.mrb[13].mxu1  ;;  %v1829_v8 = vmul.f32 0.35355338, %v1822_v4 }
 0x1ee   : > { %v1836_v9 = vsel %vm1521_vm2, %v1828_v5, -inf }
 0x1ef   : > { %1837 = vmax.xlane.f32.xlu1 %v1836_v9  ;;  %v1839_v10 = vsel %vm1521_vm2, %v1829_v8, -inf }
 0x1f3   : > { %1840 = vmax.xlane.f32.xlu1 %v1839_v10 }
 0x274   : > { %v1832_v12 = vpop.xlane.xlu0 %1831 }
 0x275   : > { %v1842_v13 = vsub.f32 %v1826_v59, %v1832_v12  ;;  %v5011_v12 = vld [vmem:[%s7145_s8] ss:$0 sm:$0xff] }
 0x277   : > { %v1846_v14 = vmul.f32 1.442695, %v1842_v13 }
 0x278   : > { %v1835_v15 = vpop.xlane.xlu0 %1834 }
 0x279   : > { %6018 = vpow2.f32 %v1846_v14  ;;  %v1843_v16 = vsub.f32 %v1827_v63, %v1835_v15 }
 0x27b   : > { %v1848_v17 = vmul.f32 1.442695, %v1843_v16 }
 0x27c   : > { %v1838_v19 = vpop.xlane.xlu1 %1837 }
 0x27d   : > { %6020 = vpow2.f32 %v1848_v17  ;;  %v1844_v20 = vsub.f32 %v1828_v5, %v1838_v19 }
 0x27f   : > { %v1850_v21 = vmul.f32 1.442695, %v1844_v20 }
 0x280   : > { %v1841_v22 = vpop.xlane.xlu1 %1840 }
 0x281   : > { %6022 = vpow2.f32 %v1850_v21  ;;  %v1845_v23 = vsub.f32 %v1829_v8, %v1841_v22 }
 0x283   : > { %v6019_v24 = vpop.eup %6018  ;;  %v1852_v25 = vmul.f32 1.442695, %v1845_v23 }
 0x284   : > { %v1854_v26 = vsel %vm1521_vm2, %v6019_v24, 0.0 }
 0x285   : > { %6024 = vpow2.f32 %v1852_v25  ;;  %1855 = vadd.xlane.f32.xlu0 %v1854_v26  ;;  %v2509_v25 = vld [vmem:[%s7148_s11 + $0x8] sm:$0xff] }
 0x287   : > { %v6021_v27 = vpop.eup %6020 }
 0x288   : > { %v1857_v28 = vsel %vm1521_vm2, %v6021_v27, 0.0 }
 0x289   : > { %1858 = vadd.xlane.f32.xlu1 %v1857_v28 }
 0x28b   : > { %v6023_v29 = vpop.eup %6022 }
 0x28c   : > { %v1860_v30 = vsel %vm1521_vm2, %v6023_v29, 0.0 }
 0x28d   : > { %1861 = vadd.xlane.f32.xlu0 %v1860_v30  ;;  %v2594_v30 = vld [vmem:[%s7150_s13 + $0x8] sm:$0xff] }
 0x28f   : > { %v6025_v31 = vpop.eup %6024 }
 0x290   : > { %v1863_v32 = vsel %vm1521_vm2, %v6025_v31, 0.0 }
 0x291   : > { %1864 = vadd.xlane.f32.xlu1 %v1863_v32 }
 0x312   : > { %v1856_v33 = vpop.xlane.xlu0 %1855 }
 0x313   : > { %6026 = vrcp.f32 %v1856_v33  ;;  %v2596_v33 = vld [vmem:[%s7150_s13 + $0x18] sm:$0xff] }
 0x316   : > { %v1859_v34 = vpop.xlane.xlu1 %1858 }
 0x317   : > { %6028 = vrcp.f32 %v1859_v34 }
 0x31a   : > { %v1862_v35 = vpop.xlane.xlu0 %1861 }
 0x31b   : > { %6030 = vrcp.f32 %v1862_v35  ;;  %v2597_v35 = vld [vmem:[%s7150_s13 + $0x20] sm:$0xff] }
 0x31d   : > { %v6027_v37 = vpop.eup %6026 }
 0x31e   : > { %v1870_v38 = vmul.f32 %v6027_v37, %v6019_v24  ;;  %v1865_v39 = vpop.xlane.xlu1 %1864  ;;  %v2508_v24 = vld [vmem:[%s7148_s11] sm:$0xff]  ;;  %v5881_v37 = vpack.c.bf16 %v2598_v36, %v2597_v35 }
 0x31f   : > { %6032 = vrcp.f32 %v1865_v39  ;;  %v5869_v26 = vpack.c.bf16 %v2509_v25, %v2508_v24  ;;  %v5025_v24 = vld [vmem:[%s7178_s23 + $0xa8] sm:$0xff]  ;;  %v5048_v25 = vld [vmem:[%s7140_s3 + $0x80] sm:$0xff] }
 0x320   : > { %5507 = vmatmul.mubr.msk.f32.vlgmr.msra.gmra.mrb[18].mxu0 %vm1521_vm2, %v1870_v38 }
 0x321   : > { %v6029_v42 = vpop.eup %6028  ;;  %5515 = vmatpush3.msra.mxu0 %v1448_v40  ;;  %5516 = vmatprep.mubr.msk.f32.mxu0 %vm6123_vm0, %v6124_v11 }
 0x322   : > { %v1871_v43 = vmul.f32 %v6029_v42, %v6021_v27  ;;  %5524 = vmatprep.subr.mxu0 %v6124_v11  ;;  %v2511_v27 = vld [vmem:[%s7148_s11 + $0x18] sm:$0xff]  ;;  %v5012_v42 = vld [vmem:[%s7146_s9] ss:$0 sm:$0xff] }
 0x324   : > { %5512 = vmatmul.mubr.msk.f32.vlgmr.msra.gmra.mrb[14].mxu1 %vm1521_vm2, %v1871_v43 }
 0x325   : > { %v6031_v45 = vpop.eup %6030  ;;  %5520 = vmatpush3.msra.mxu1 %v1518_v44  ;;  %5521 = vmatprep.mubr.msk.f32.mxu1 %vm6123_vm0, %v6124_v11  ;;  %v5013_v44 = vld [vmem:[%s7147_s10] ss:$0 sm:$0xff] }
 0x326   : > { %v1872_v46 = vmul.f32 %v6031_v45, %v6023_v29  ;;  %5529 = vmatprep.subr.mxu1 %v6124_v11  ;;  %v2593_v29 = vld [vmem:[%s7150_s13] sm:$0xff] }
 0x327   : > { %v5875_v32 = vpack.c.bf16 %v2594_v30, %v2593_v29  ;;  %v5026_v30 = vld [vmem:[%s7178_s23 + $0xb0] sm:$0xff] }
 0x328   : > { %5517 = vmatmul.mubr.msk.f32.vlgmr.msra.gmra.mrb[20].mxu0 %vm1521_vm2, %v1872_v46 }
 0x329   : > { %v6033_v47 = vpop.eup %6032  ;;  %5526 = vmatprep.mubr.msk.f32.mxu0 %vm6123_vm0, %v6124_v11  ;;  %5525 = vmatpush3.msra.mxu0 %v2166_v49 }
 0x32a   : > { %v1873_v48 = vmul.f32 %v6033_v47, %v6025_v31  ;;  %5534 = vmatprep.subr.mxu0 %v6124_v11  ;;  %v2595_v31 = vld [vmem:[%s7150_s13 + $0x10] sm:$0xff] }
 0x32b   : > { %v5878_v34 = vpack.c.bf16 %v2596_v33, %v2595_v31  ;;  %v2599_v47 = vld [vmem:[%s7150_s13 + $0x30] sm:$0xff] }
 0x32c   : > { %5522 = vmatmul.mubr.msk.f32.vlgmr.msra.gmra.mrb[16].mxu1 %vm1521_vm2, %v1873_v48  ;;  %v2600_v48 = vld [vmem:[%s7150_s13 + $0x38] sm:$0xff]  ;;  %v5050_v33 = vld [vmem:[%s7140_s3 + $0x90] sm:$0xff] }
 0x32d   : > { %5531 = vmatprep.mubr.msk.f32.mxu1 %vm6123_vm0, %v6124_v11  ;;  %5530 = vmatpush3.msra.mxu1 %v2167_v50  ;;  %v5884_v49 = vpack.c.bf16 %v2600_v48, %v2599_v47  ;;  %v5014_v50 = vld [vmem:[%s7149_s12] ss:$0 sm:$0xff] }
 0x32e   : > { %5539 = vmatprep.subr.mxu1 %v6124_v11 }
 0x3f3   : > { %v1943_v52 = vpop.f32.mrb[18].mxu0 }
 0x3f4   : > { %v5508_v53 = vpop.f32.mrb[19].mxu0  ;;  %5527 = vmatmul.mubr.msk.f32.vlgmr.msra.gmra.mrb[22].mxu0 %vm1521_vm2, %v1943_v52 }
 0x3f5   : > { %5535 = vmatpush3.msra.mxu0 %v2168_v51  ;;  %5536 = vmatprep.mubr.msk.f32.mxu0 %vm6123_vm0, %v6124_v11 }
 0x3f6   : > { %5868 = vmatprep.subr.bf16.mxu0 %v6122_v3 }
 0x3f7   : > { %v2016_v55 = vpop.f32.mrb[14].mxu1 }
 0x3f8   : > { %v5513_v56 = vpop.f32.mrb[15].mxu1  ;;  %5532 = vmatmul.mubr.msk.f32.vlgmr.msra.gmra.mrb[18].mxu1 %vm1521_vm2, %v2016_v55  ;;  %v5016_v55 = vld [vmem:[%s7151_s14] ss:$0 sm:$0xff] }
 0x3f9   : > { %5540 = vmatpush3.msra.mxu1 %v2169_v54  ;;  %5541 = vmatprep.mubr.msk.f32.mxu1 %vm6123_vm0, %v6124_v11 }
 0x3fa   : > { %5874 = vmatprep.subr.bf16.mxu1 %v6122_v3 }
 0x3fb   : > { %v2089_v57 = vpop.f32.mrb[20].mxu0 }
 0x3fc   : > { %v5518_v58 = vpop.f32.mrb[21].mxu0  ;;  %5537 = vmatmul.mubr.msk.f32.vlgmr.msra.gmra.mrb[24].mxu0 %vm1521_vm2, %v2089_v57 }
 0x3fd   : > { %5552 = vmatprep.mubr.msk.f32.mxu0 %vm6123_vm0, %v6124_v11  ;;  %5870 = vmatpush3.bf16.msra.mxu0 %v5869_v26  ;;  %v5049_v26 = vld [vmem:[%s7140_s3 + $0x88] sm:$0xff] }
 0x3fe   : > { %5871 = vmatprep.subr.bf16.mxu0 %v6122_v3  ;;  %v5911_v29 = vpack.c.bf16 %v5049_v26, %v5048_v25 }
 0x3ff   : > { %v2162_v59 = vpop.f32.mrb[16].mxu1 }
 0x400   : > { %v5523_v60 = vpop.f32.mrb[17].mxu1  ;;  %5542 = vmatmul.mubr.msk.f32.vlgmr.msra.gmra.mrb[20].mxu1 %vm1521_vm2, %v2162_v59 }
 0x401   : > { %5571 = vmatprep.mubr.msk.f32.mxu1 %vm6123_vm0, %v6124_v11  ;;  %5876 = vmatpush3.bf16.msra.mxu1 %v5875_v32  ;;  %v5027_v32 = vld [vmem:[%s7178_s23 + $0xb8] sm:$0xff] }
 0x402   : > { %5877 = vmatprep.subr.bf16.mxu1 %v6122_v3  ;;  %v5896_v35 = vpack.c.bf16 %v5027_v32, %v5026_v30  ;;  %v5040_v30 = vld [vmem:[%s7180_s2 + $0x4] ss:$0 sm:$0xff] }
 0x405   : > { %5879 = vmatpush3.bf16.msra.mxu1 %v5878_v34  ;;  %v5051_v34 = vld [vmem:[%s7140_s3 + $0x98] sm:$0xff] }
 0x406   : > { %5880 = vmatprep.subr.bf16.mxu1 %v6122_v3  ;;  %v5914_v36 = vpack.c.bf16 %v5051_v34, %v5050_v33 }
 0x409   : > { %5882 = vmatpush3.bf16.msra.mxu1 %v5881_v37  ;;  %v5032_v37 = vld [vmem:[%s7178_s23 + $0xe0] sm:$0xff] }
 0x40a   : > { %5883 = vmatprep.subr.bf16.mxu1 %v6122_v3 }
 0x40d   : > { %5885 = vmatpush3.bf16.msra.mxu1 %v5884_v49  ;;  %v5052_v49 = vld [vmem:[%s7140_s3 + $0xa0] sm:$0xff] }
 0x40e   : > { %5898 = vmatprep.subr.bf16.mxu1 %v6122_v3 }
 0x4c7   : > { %v2239_v61 = vpop.f32.mrb[22].mxu0 }
 0x4c8   : > { %v5528_v62 = vpop.f32.mrb[23].mxu0  ;;  %v2462_v0 = vsel %vm589_vm1, %v2239_v61, 0.0 }
 0x4cb   : > { %v2312_v63 = vpop.f32.mrb[18].mxu1 }
 0x4cc   : > { %v2463_v1 = vsel %vm589_vm1, %v2312_v63, 0.0  ;;  %v5533_v2 = vpop.f32.mrb[19].mxu1 }
 0x4cd   : > { %v2464_v4 = vadd.f32 %v2463_v1, %v2462_v0  ;;  %v5020_v2 = vld [vmem:[%s7178_s23 + $0x80] sm:$0xff] }
 0x4cf   : > { %v2385_v5 = vpop.f32.mrb[24].mxu0 }
 0x4d0   : > { %v2465_v6 = vsel %vm589_vm1, %v2385_v5, 0.0  ;;  %v5538_v7 = vpop.f32.mrb[25].mxu0  ;;  %v5028_v5 = vld [vmem:[%s7178_s23 + $0xc0] sm:$0xff] }
 0x4d1   : > { %v2466_v8 = vadd.f32 %v2465_v6, %v2464_v4  ;;  %v5021_v4 = vld [vmem:[%s7178_s23 + $0x88] sm:$0xff] }
 0x4d2   : > { %v5887_v6 = vpack.c.bf16 %v5021_v4, %v5020_v2  ;;  %v5029_v7 = vld [vmem:[%s7178_s23 + $0xc8] sm:$0xff]  ;;  %v5062_v4 = vld [vmem:[%s7140_s3 + $0xf0] sm:$0xff] }
 0x4d3   : > { %v2458_v9 = vpop.f32.mrb[20].mxu1 }
 0x4d4   : > { %v2467_v10 = vsel %vm589_vm1, %v2458_v9, 0.0  ;;  %v5543_v13 = vpop.f32.mrb[21].mxu1  ;;  %v5022_v9 = vld [vmem:[%s7178_s23 + $0x90] sm:$0xff] }
 0x4d5   : > { %v2468_v14 = vadd.f32 %v2467_v10, %v2466_v8  ;;  %v5899_v8 = vpack.c.bf16 %v5029_v7, %v5028_v5  ;;  %v5023_v10 = vld [vmem:[%s7178_s23 + $0x98] sm:$0xff] }
 0x4d6   : > { %v5890_v13 = vpack.c.bf16 %v5023_v10, %v5022_v9  ;;  %v5063_v5 = vld [vmem:[%s7140_s3 + $0xf8] sm:$0xff]  ;;  %v5080_v10 = vld [vmem:[%s7142_s5 + $0xa0] sm:$0xff] }
 0x4d7   : > { %v2476_v15 = vadd.f32 %v5011_v12, %v2468_v14  ;;  %v5030_v12 = vld [vmem:[%s7178_s23 + $0xd0] sm:$0xff]  ;;  %v5031_v14 = vld [vmem:[%s7178_s23 + $0xd8] sm:$0xff] }
 0x4d8   : > { %v5087_v7 = vld [vmem:[%s7142_s5 + $0xd8] sm:$0xff] }
 0x4d9   : > { %v2477_v16 = vadd.f32 %v2476_v15, %v6313_v18  ;;  %v2510_v18 = vld [vmem:[%s7148_s11 + $0x10] sm:$0xff]  ;;  %v5902_v15 = vpack.c.bf16 %v5031_v14, %v5030_v12  ;;  %v5081_v12 = vld [vmem:[%s7142_s5 + $0xa8] sm:$0xff] }
 0x4da   : > { %v5872_v28 = vpack.c.bf16 %v2511_v27, %v2510_v18  ;;  %v5019_v18 = vld [vmem:[%s7153_s16] ss:$0 sm:$0xff]  ;;  %v5082_v14 = vld [vmem:[%s7142_s5 + $0xb0] sm:$0xff] }
 0x4db   : > { %v2480_v17 = vsel %vm589_vm1, %v2477_v16, 0.0 }
 0x4dc   : > { %2481 = vadd.xlane.f32.xlu0 %v2480_v17  ;;  %5873 = vmatpush3.bf16.msra.mxu0 %v5872_v28 }
 0x4dd   : > { %5886 = vmatprep.subr.bf16.mxu0 %v6122_v3 }
 0x569   : > { %v2482_v19 = vpop.xlane.xlu0 %2481 }
 0x56a   : > { %v2484_v20 = vmul.f32 0.03125, %v2482_v19 }
 0x56c   : > { %v2485_v21 = vsub.f32 %v2477_v16, %v2484_v20 }
 0x56e   : > { %v2486_v22 = vmul.f32 %v2485_v21, %v2485_v21 }
 0x570   : > { %v2487_v23 = vsel %vm589_vm1, %v2486_v22, 0.0  ;;  %v5024_v22 = vld [vmem:[%s7178_s23 + $0xa0] sm:$0xff] }
 0x571   : > { %2488 = vadd.xlane.f32.xlu1 %v2487_v23  ;;  %v5893_v28 = vpack.c.bf16 %v5025_v24, %v5024_v22  ;;  %v5091_v22 = vld [vmem:[%s7142_s5 + $0xf8] sm:$0xff] }
 0x5fe   : > { %v2489_v38 = vpop.xlane.xlu1 %2488 }
 0x5ff   : > { %v2490_v39 = vmul.f32 0.03125, %v2489_v38  ;;  %v5033_v38 = vld [vmem:[%s7178_s23 + $0xe8] sm:$0xff] }
 0x601   : > { %v2491_v40 = vadd.f32 1e-05, %v2490_v39  ;;  %v5056_v39 = vld [vmem:[%s7140_s3 + $0xc0] sm:$0xff] }
 0x603   : > { %6034 = vrsqrt.f32 %v2491_v40  ;;  %v5057_v40 = vld [vmem:[%s7140_s3 + $0xc8] sm:$0xff] }
 0x60d   : > { %v6035_v41 = vpop.eup %6034 }
 0x60e   : > { %v2493_v43 = vmul.f32 %v6035_v41, %v2485_v21  ;;  %v5018_v21 = vld [vmem:[%s7152_s15] ss:$0 sm:$0xff]  ;;  %v5905_v41 = vpack.c.bf16 %v5033_v38, %v5032_v37 }
 0x610   : > { %v2500_v45 = vmul.f32 %v5012_v42, %v2493_v43  ;;  %v5923_v42 = vpack.c.bf16 %v5057_v40, %v5056_v39  ;;  %v5034_v43 = vld [vmem:[%s7178_s23 + $0xf0] sm:$0xff]  ;;  %v5042_v39 = vld [vmem:[%s7180_s2 + $0x6] ss:$0 sm:$0xff] }
 0x612   : > { %v2507_v46 = vadd.f32 %v5013_v44, %v2500_v45  ;;  %v5035_v44 = vld [vmem:[%s7178_s23 + $0xf8] sm:$0xff]  ;;  %v5058_v45 = vld [vmem:[%s7140_s3 + $0xd0] sm:$0xff] }
 0x613   : > { %v5908_v47 = vpack.c.bf16 %v5035_v44, %v5034_v43  ;;  %v5069_v44 = vld [vmem:[%s7141_s4 + $0x5] ss:$0 sm:$0xff] }
 0x614   : > { %5553 = vmatmul.mubr.msk.f32.vlgmr.msra.gmra.mrb[26].mxu0 %vm589_vm1, %v2507_v46 }
 0x615   : > { %5582 = vmatprep.mubr.msk.f32.mxu0 %vm6123_vm0, %v6124_v11  ;;  %5888 = vmatpush3.bf16.msra.mxu0 %v5887_v6  ;;  %v5086_v6 = vld [vmem:[%s7142_s5 + $0xd0] sm:$0xff] }
 0x616   : > { %5889 = vmatprep.subr.bf16.mxu0 %v6122_v3  ;;  %v5950_v9 = vpack.c.bf16 %v5087_v7, %v5086_v6 }
 0x619   : > { %5891 = vmatpush3.bf16.msra.mxu0 %v5890_v13  ;;  %v5941_v13 = vpack.c.bf16 %v5081_v12, %v5080_v10 }
 0x61a   : > { %5892 = vmatprep.subr.bf16.mxu0 %v6122_v3 }
 0x6e7   : > { %v2588_v51 = vpop.f32.mrb[26].mxu0 }
 0x6e8   : > { %v2589_v52 = vadd.f32 %v5014_v50, %v2588_v51  ;;  %v5554_v53 = vpop.f32.mrb[27].mxu0  ;;  %v5053_v50 = vld [vmem:[%s7140_s3 + $0xa8] sm:$0xff]  ;;  %v5076_v51 = vld [vmem:[%s7142_s5 + $0x80] sm:$0xff] }
 0x6e9   : > { %v5917_v53 = vpack.c.bf16 %v5053_v50, %v5052_v49 }
 0x6ea   : > { %v2592_v54 = vmax.f32 %v2589_v52, 0.0  ;;  %v5077_v52 = vld [vmem:[%s7142_s5 + $0x88] sm:$0xff] }
 0x6ec   : > { %5572 = vmatmul.mubr.msk.f32.vlgmr.msra.gmra.mrb[22].mxu1 %vm2608_vm3, %v2592_v54  ;;  %v5935_v54 = vpack.c.bf16 %v5077_v52, %v5076_v51 }
 0x6ed   : > { %5604 = vmatprep.mubr.msk.f32.mxu1 %vm6123_vm0, %v6124_v11  ;;  %5900 = vmatpush3.bf16.msra.mxu1 %v5899_v8  ;;  %v5932_v8 = vpack.c.bf16 %v5063_v5, %v5062_v4 }
 0x6ee   : > { %5901 = vmatprep.subr.bf16.mxu1 %v6122_v3 }
 0x6f1   : > { %5903 = vmatpush3.bf16.msra.mxu1 %v5902_v15  ;;  %v5083_v15 = vld [vmem:[%s7142_s5 + $0xb8] sm:$0xff] }
 0x6f2   : > { %5910 = vmatprep.subr.bf16.mxu1 %v6122_v3 }
 0x7bf   : > { %v2678_v56 = vpop.f32.mrb[22].mxu1 }
 0x7c0   : > { %v2679_v57 = vadd.f32 %v5016_v55, %v2678_v56  ;;  %v5573_v58 = vpop.f32.mrb[23].mxu1  ;;  %v5054_v55 = vld [vmem:[%s7140_s3 + $0xb0] sm:$0xff]  ;;  %v5055_v56 = vld [vmem:[%s7140_s3 + $0xb8] sm:$0xff] }
 0x7c1   : > { %v5079_v58 = vld [vmem:[%s7142_s5 + $0x98] sm:$0xff] }
 0x7c2   : > { %v2682_v59 = vadd.f32 %v2679_v57, %v2507_v46  ;;  %v5059_v46 = vld [vmem:[%s7140_s3 + $0xd8] sm:$0xff]  ;;  %v5078_v57 = vld [vmem:[%s7142_s5 + $0x90] sm:$0xff] }
 0x7c3   : > { %v5926_v48 = vpack.c.bf16 %v5059_v46, %v5058_v45  ;;  %v5096_v45 = vld [vmem:[%s7143_s6 + $0x4] ss:$0 sm:$0xff] }
 0x7c4   : > { %v2685_v60 = vsel %vm589_vm1, %v2682_v59, 0.0 }
 0x7c5   : > { %2686 = vadd.xlane.f32.xlu0 %v2685_v60  ;;  %v5938_v60 = vpack.c.bf16 %v5079_v58, %v5078_v57  ;;  %v5043_v57 = vld [vmem:[%s7180_s2 + $0x7] ss:$0 sm:$0xff] }
 0x852   : > { %v2687_v61 = vpop.xlane.xlu0 %2686 }
 0x853   : > { %v2688_v62 = vmul.f32 0.03125, %v2687_v61  ;;  %v5060_v61 = vld [vmem:[%s7140_s3 + $0xe0] sm:$0xff] }
 0x855   : > { %v2689_v63 = vsub.f32 %v2682_v59, %v2688_v62  ;;  %v5920_v59 = vpack.c.bf16 %v5055_v56, %v5054_v55  ;;  %v5061_v62 = vld [vmem:[%s7140_s3 + $0xe8] sm:$0xff] }
 0x857   : > { %v2690_v0 = vmul.f32 %v2689_v63, %v2689_v63 }
 0x859   : > { %v2691_v1 = vsel %vm589_vm1, %v2690_v0, 0.0  ;;  %v5085_v0 = vld [vmem:[%s7142_s5 + $0xc8] sm:$0xff] }
 0x85a   : > { %2692 = vadd.xlane.f32.xlu1 %v2691_v1  ;;  %v5929_v1 = vpack.c.bf16 %v5061_v62, %v5060_v61  ;;  %v5097_v62 = vld [vmem:[%s7143_s6 + $0x5] ss:$0 sm:$0xff] }
 0x8e7   : > { %v2693_v16 = vpop.xlane.xlu1 %2692 }
 0x8e8   : > { %v2694_v17 = vmul.f32 0.03125, %v2693_v16  ;;  %v5944_v16 = vpack.c.bf16 %v5083_v15, %v5082_v14 }
 0x8ea   : > { %v2695_v19 = vadd.f32 1e-05, %v2694_v17  ;;  %v5088_v17 = vld [vmem:[%s7142_s5 + $0xe0] sm:$0xff] }
 0x8ec   : > { %6036 = vrsqrt.f32 %v2695_v19  ;;  %v5089_v19 = vld [vmem:[%s7142_s5 + $0xe8] sm:$0xff] }
 0x8f6   : > { %v6037_v20 = vpop.eup %6036 }
 0x8f7   : > { %v2697_v23 = vmul.f32 %v6037_v20, %v2689_v63  ;;  %v5084_v63 = vld [vmem:[%s7142_s5 + $0xc0] sm:$0xff]  ;;  %v5953_v20 = vpack.c.bf16 %v5089_v19, %v5088_v17 }
 0x8f8   : > { %v5947_v2 = vpack.c.bf16 %v5085_v0, %v5084_v63 }
 0x8f9   : > { %v2704_v27 = vmul.f32 %v5018_v21, %v2697_v23  ;;  %v5090_v21 = vld [vmem:[%s7142_s5 + $0xf0] sm:$0xff] }
 0x8fa   : > { %v5956_v23 = vpack.c.bf16 %v5091_v22, %v5090_v21 }
 0x8fb   : > { %v6728_v31 = vadd.f32 %v5019_v18, %v2704_v27  ;;  %v5068_v27 = vld [vmem:[%s7141_s4 + $0x4] ss:$0 sm:$0xff] }
 0x8fd   : > { %5583 = vmatmul.mubr.msk.f32.vlgmr.msra.gmra.mrb[28].mxu0 %vm589_vm1, %v6728_v31  ;;  %5605 = vmatmul.mubr.msk.f32.vlgmr.msra.gmra.mrb[24].mxu1 %vm589_vm1, %v6728_v31 }
 0x8fe   : > { %5894 = vmatpush3.bf16.msra.mxu0 %v5893_v28  ;;  %5912 = vmatpush3.bf16.msra.mxu1 %v5911_v29 }
 0x8ff   : > { %5895 = vmatprep.subr.bf16.mxu0 %v6122_v3  ;;  %5913 = vmatprep.subr.bf16.mxu1 %v6122_v3 }
 0x900   : > { %5593 = vmatprep.mubr.msk.f32.mxu0 %vm6123_vm0, %v6124_v11  ;;  %5626 = vmatprep.mubr.msk.f32.mxu1 %vm6123_vm0, %v6124_v11 }
 0x902   : > { %5897 = vmatpush3.bf16.msra.mxu0 %v5896_v35  ;;  %5915 = vmatpush3.bf16.msra.mxu1 %v5914_v36  ;;  %v5070_v36 = vld [vmem:[%s7141_s4 + $0x6] ss:$0 sm:$0xff] }
 0x903   : > { %5904 = vmatprep.subr.bf16.mxu0 %v6122_v3  ;;  %5922 = vmatprep.subr.bf16.mxu1 %v6122_v3 }
 0x905   : > { %5594 = vmatmul.mubr.msk.f32.vlgmr.msra.gmra.mrb[30].mxu0 %vm589_vm1, %v6728_v31  ;;  %5627 = vmatmul.mubr.msk.f32.vlgmr.msra.gmra.mrb[26].mxu1 %vm589_vm1, %v6728_v31 }
 0x906   : > { %5906 = vmatpush3.bf16.msra.mxu0 %v5905_v41  ;;  %5924 = vmatpush3.bf16.msra.mxu1 %v5923_v42 }
 0x907   : > { %5907 = vmatprep.subr.bf16.mxu0 %v6122_v3  ;;  %5925 = vmatprep.subr.bf16.mxu1 %v6122_v3 }
 0x908   : > { %5615 = vmatprep.mubr.msk.f32.mxu0 %vm6123_vm0, %v6124_v11  ;;  %5648 = vmatprep.mubr.msk.f32.mxu1 %vm6123_vm0, %v6124_v11 }
 0x90a   : > { %5909 = vmatpush3.bf16.msra.mxu0 %v5908_v47  ;;  %5927 = vmatpush3.bf16.msra.mxu1 %v5926_v48  ;;  %v5041_v48 = vld [vmem:[%s7180_s2 + $0x5] ss:$0 sm:$0xff]  ;;  %s7094_s2 = scalar_lea.hbm %s7182_s17, %s5153_s0 }
 0x90b   : > { %5916 = vmatprep.subr.bf16.mxu0 %v6122_v3  ;;  %5934 = vmatprep.subr.bf16.mxu1 %v6122_v3 }
 0x90d   : > { %5616 = vmatmul.mubr.msk.f32.vlgmr.msra.gmra.mrb[32].mxu0 %vm589_vm1, %v6728_v31  ;;  %5649 = vmatmul.mubr.msk.f32.vlgmr.msra.gmra.mrb[28].mxu1 %vm589_vm1, %v6728_v31 }
 0x90e   : > { %5918 = vmatpush3.bf16.msra.mxu0 %v5917_v53  ;;  %5936 = vmatpush3.bf16.msra.mxu1 %v5935_v54  ;;  %v5071_v54 = vld [vmem:[%s7141_s4 + $0x7] ss:$0 sm:$0xff] }
 0x90f   : > { %5919 = vmatprep.subr.bf16.mxu0 %v6122_v3  ;;  %5937 = vmatprep.subr.bf16.mxu1 %v6122_v3 }
 0x910   : > { %5637 = vmatprep.mubr.msk.f32.mxu0 %vm6123_vm0, %v6124_v11  ;;  %5670 = vmatprep.mubr.msk.f32.mxu1 %vm6123_vm0, %v6124_v11 }
 0x912   : > { %5921 = vmatpush3.bf16.msra.mxu0 %v5920_v59  ;;  %5939 = vmatpush3.bf16.msra.mxu1 %v5938_v60 }
 0x913   : > { %5928 = vmatprep.subr.bf16.mxu0 %v6122_v3  ;;  %5946 = vmatprep.subr.bf16.mxu1 %v6122_v3 }
 0x915   : > { %5638 = vmatmul.mubr.msk.f32.vlgmr.msra.gmra.mrb[34].mxu0 %vm589_vm1, %v6728_v31  ;;  %5671 = vmatmul.mubr.msk.f32.vlgmr.msra.gmra.mrb[30].mxu1 %vm589_vm1, %v6728_v31 }
 0x916   : > { %5930 = vmatpush3.bf16.msra.mxu0 %v5929_v1  ;;  %5948 = vmatpush3.bf16.msra.mxu1 %v5947_v2 }
 0x917   : > { %5931 = vmatprep.subr.bf16.mxu0 %v6122_v3  ;;  %5949 = vmatprep.subr.bf16.mxu1 %v6122_v3 }
 0x918   : > { %5659 = vmatprep.mubr.msk.f32.mxu0 %vm6123_vm0, %v6124_v11  ;;  %5692 = vmatprep.mubr.msk.f32.mxu1 %vm6123_vm0, %v6124_v11 }
 0x91a   : > { %5933 = vmatpush3.bf16.msra.mxu0 %v5932_v8  ;;  %5951 = vmatpush3.bf16.msra.mxu1 %v5950_v9 }
 0x91b   : > { %5940 = vmatprep.subr.bf16.mxu0 %v6122_v3  ;;  %5706 = vmatprep.subr.mxu1 %v6124_v11 }
 0x91d   : > { %5660 = vmatmul.mubr.msk.f32.vlgmr.msra.gmra.mrb[36].mxu0 %vm589_vm1, %v6728_v31  ;;  %5693 = vmatmul.mubr.msk.f32.vlgmr.msra.gmra.mrb[32].mxu1 %vm589_vm1, %v6728_v31 }
 0x91e   : > { %5942 = vmatpush3.bf16.msra.mxu0 %v5941_v13  ;;  %5681 = vmatprep.mubr.msk.f32.mxu0 %vm6123_vm0, %v6124_v11 }
 0x91f   : > { %5943 = vmatprep.subr.bf16.mxu0 %v6122_v3  ;;  %5708 = vmatprep.mubr.msk.f32.mxu1 %vm6123_vm0, %v6124_v11 }
 0x922   : > { %5945 = vmatpush3.bf16.msra.mxu0 %v5944_v16 }
 0x923   : > { %5952 = vmatprep.subr.bf16.mxu0 %v6122_v3 }
 0x925   : > { %5682 = vmatmul.mubr.msk.f32.vlgmr.msra.gmra.mrb[38].mxu0 %vm589_vm1, %v6728_v31 }
 0x926   : > { %5954 = vmatpush3.bf16.msra.mxu0 %v5953_v20  ;;  %5703 = vmatprep.mubr.msk.f32.mxu0 %vm6123_vm0, %v6124_v11 }
 0x927   : > { %5955 = vmatprep.subr.bf16.mxu0 %v6122_v3 }
 0x92a   : > { %5957 = vmatpush3.bf16.msra.mxu0 %v5956_v23 }
 0x92b   : > { %5716 = vmatprep.subr.mxu0 %v6124_v11 }
 0x92d   : > { %5704 = vmatmul.mubr.msk.f32.vlgmr.msra.gmra.mrb[40].mxu0 %vm589_vm1, %v6728_v31 }
 0x92e   : > { %5718 = vmatprep.mubr.msk.f32.mxu0 %vm6123_vm0, %v6124_v11 }
 0x9d0   : > { %v2827_v24 = vpop.f32.mrb[28].mxu0  ;;  %v2967_v25 = vpop.f32.mrb[24].mxu1 }
 0x9d1   : > { %v5584_v26 = vpop.f32.mrb[29].mxu0  ;;  %v5606_v18 = vpop.f32.mrb[25].mxu1  ;;  %v2828_v35 = vadd.f32 %v5040_v30, %v2827_v24  ;;  %v2968_v43 = vadd.f32 %v5042_v39, %v2967_v25 }
 0x9d8   : > { %v2897_v28 = vpop.f32.mrb[30].mxu0  ;;  %v3153_v29 = vpop.f32.mrb[26].mxu1 }
 0x9d9   : > { %v3154_v32 = vadd.f32 %v5068_v27, %v3153_v29  ;;  %v5595_v33 = vpop.f32.mrb[31].mxu0  ;;  %v5628_v34 = vpop.f32.mrb[27].mxu1  ;;  %v2898_v53 = vadd.f32 %v5041_v48, %v2897_v28 }
 0x9db   : > { %5707 = vmatpush3.xpose.msk.msra.mxu1 %vm1521_vm2, %v3154_v32 }
 0x9dc   : > { %5711 = vmatprep.subr.mxu1 %v6124_v11 }
 0x9de   : > { %5709 = vmatmul.mubr.msk.f32.vlgmr.msra.gmra.mrb[34].mxu1 %vm1521_vm2, %v2828_v35 }
 0x9df   : > { %5713 = vmatprep.mubr.msk.f32.mxu1 %vm6123_vm0, %v6124_v11 }
 0x9e0   : > { %v3037_v37 = vpop.f32.mrb[32].mxu0  ;;  %v3293_v38 = vpop.f32.mrb[28].mxu1 }
 0x9e1   : > { %v3294_v40 = vadd.f32 %v5070_v36, %v3293_v38  ;;  %v5617_v41 = vpop.f32.mrb[33].mxu0  ;;  %v5650_v42 = vpop.f32.mrb[29].mxu1  ;;  %v3038_v61 = vadd.f32 %v5043_v57, %v3037_v37 }
 0x9e3   : > { %5717 = vmatpush3.xpose.msk.msra.mxu0 %vm1521_vm2, %v3294_v40 }
 0x9e4   : > { %5726 = vmatprep.subr.mxu0 %v6124_v11 }
 0x9e6   : > { %5719 = vmatmul.mubr.msk.f32.vlgmr.msra.gmra.mrb[42].mxu0 %vm1521_vm2, %v2968_v43 }
 0x9e7   : > { %5728 = vmatprep.mubr.msk.f32.mxu0 %vm6123_vm0, %v6124_v11 }
 0x9e8   : > { %v3223_v46 = vpop.f32.mrb[34].mxu0  ;;  %v3479_v47 = vpop.f32.mrb[30].mxu1 }
 0x9e9   : > { %v3224_v49 = vadd.f32 %v5069_v44, %v3223_v46  ;;  %v3480_v50 = vadd.f32 %v5096_v45, %v3479_v47  ;;  %v5639_v51 = vpop.f32.mrb[35].mxu0  ;;  %v5672_v52 = vpop.f32.mrb[31].mxu1  ;;  %v5098_v45 = vld [vmem:[%s7143_s6 + $0x6] ss:$0 sm:$0xff] }
 0x9eb   : > { %5712 = vmatpush3.xpose.msk.msra.mxu1 %vm1521_vm2, %v3224_v49  ;;  %5727 = vmatpush3.msra.mxu0 %v3480_v50 }
 0x9ec   : > { %5721 = vmatprep.subr.mxu1 %v6124_v11  ;;  %5736 = vmatprep.subr.mxu0 %v6124_v11 }
 0x9ee   : > { %5714 = vmatmul.mubr.msk.f32.vlgmr.msra.gmra.mrb[36].mxu1 %vm1521_vm2, %v2898_v53  ;;  %v5099_v53 = vld [vmem:[%s7143_s6 + $0x7] ss:$0 sm:$0xff] }
 0x9ef   : > { %5723 = vmatprep.mubr.msk.f32.mxu1 %vm6123_vm0, %v6124_v11 }
 0x9f0   : > { %v3363_v55 = vpop.f32.mrb[36].mxu0  ;;  %v6943_v56 = vpop.f32.mrb[32].mxu1 }
 0x9f1   : > { %v3364_v58 = vadd.f32 %v5071_v54, %v3363_v55  ;;  %v5661_v59 = vpop.f32.mrb[37].mxu0  ;;  %v5694_v60 = vpop.f32.mrb[33].mxu1  ;;  %v3620_v48 = vadd.f32 %v5098_v45, %v6943_v56  ;;  %v5142_v45 = vld [vmem:[%s7150_s13 + $0x68] sm:$0xff] }
 0x9f2   : > { %v5116_v59 = vld [vmem:[%s7144_s7 + $0x20] sm:$0xff]  ;;  %v5117_v60 = vld [vmem:[%s7144_s7 + $0x28] sm:$0xff] }
 0x9f3   : > { %5722 = vmatpush3.xpose.msk.msra.mxu1 %vm1521_vm2, %v3364_v58 }
 0x9f4   : > { %5731 = vmatprep.subr.mxu1 %v6124_v11 }
 0x9f6   : > { %5724 = vmatmul.mubr.msk.f32.vlgmr.msra.gmra.mrb[38].mxu1 %vm1521_vm2, %v3038_v61  ;;  %v5118_v61 = vld [vmem:[%s7144_s7 + $0x30] sm:$0xff] }
 0x9f7   : > { %5733 = vmatprep.mubr.msk.f32.mxu1 %vm6123_vm0, %v6124_v11 }
 0x9f8   : > { %v3549_v63 = vpop.f32.mrb[38].mxu0 }
 0x9f9   : > { %v3550_v0 = vadd.f32 %v5097_v62, %v3549_v63  ;;  %v5683_v1 = vpop.f32.mrb[39].mxu0 }
 0x9fb   : > { %5732 = vmatpush3.msra.mxu1 %v3550_v0 }
 0x9fc   : > { %5741 = vmatprep.subr.mxu1 %v6124_v11 }
 0xa00   : > { %v6957_v2 = vpop.f32.mrb[40].mxu0 }
 0xa01   : > { %v5705_v4 = vpop.f32.mrb[41].mxu0  ;;  %v3690_v56 = vadd.f32 %v5099_v53, %v6957_v2  ;;  %v5119_v2 = vld [vmem:[%s7144_s7 + $0x38] sm:$0xff]  ;;  %v5129_v53 = vld [vmem:[%s7147_s10 + $0x1] ss:$0 sm:$0xff] }
 0xab1   : > { %v3765_v5 = vpop.f32.mrb[34].mxu1 }
 0xab2   : > { %v3997_v6 = vmul.f32 0.35355338, %v3765_v5  ;;  %v5710_v7 = vpop.f32.mrb[35].mxu1 }
 0xab4   : > { %v4001_v8 = vsel %vm1521_vm2, %v3997_v6, -inf }
 0xab5   : > { %4002 = vmax.xlane.f32.xlu0 %v4001_v8 }
 0xab9   : > { %v3917_v9 = vpop.f32.mrb[42].mxu0 }
 0xaba   : > { %v3999_v10 = vmul.f32 0.35355338, %v3917_v9  ;;  %v5720_v12 = vpop.f32.mrb[43].mxu0 }
 0xabc   : > { %v4007_v13 = vsel %vm1521_vm2, %v3999_v10, -inf }
 0xabd   : > { %4008 = vmax.xlane.f32.xlu0 %v4007_v13 }
 0xac1   : > { %v3841_v14 = vpop.f32.mrb[36].mxu1 }
 0xac2   : > { %v3998_v15 = vmul.f32 0.35355338, %v3841_v14  ;;  %v5715_v16 = vpop.f32.mrb[37].mxu1 }
 0xac4   : > { %v4004_v17 = vsel %vm1521_vm2, %v3998_v15, -inf }
 0xac5   : > { %4005 = vmax.xlane.f32.xlu1 %v4004_v17 }
 0xac9   : > { %v3993_v19 = vpop.f32.mrb[38].mxu1 }
 0xaca   : > { %v4000_v20 = vmul.f32 0.35355338, %v3993_v19  ;;  %v5725_v21 = vpop.f32.mrb[39].mxu1 }
 0xacc   : > { %v4010_v22 = vsel %vm1521_vm2, %v4000_v20, -inf }
 0xacd   : > { %4011 = vmax.xlane.f32.xlu1 %v4010_v22 }
 0xb42   : > { %v4003_v23 = vpop.xlane.xlu0 %4002 }
 0xb43   : > { %v4013_v24 = vsub.f32 %v3997_v6, %v4003_v23 }
 0xb45   : > { %v4017_v25 = vmul.f32 1.442695, %v4013_v24 }
 0xb47   : > { %6038 = vpow2.f32 %v4017_v25 }
 0xb4a   : > { %v4009_v26 = vpop.xlane.xlu0 %4008 }
 0xb4b   : > { %v4015_v18 = vsub.f32 %v3999_v10, %v4009_v26 }
 0xb4d   : > { %v4021_v27 = vmul.f32 1.442695, %v4015_v18 }
 0xb4f   : > { %6040 = vpow2.f32 %v4021_v27 }
 0xb51   : > { %v6039_v28 = vpop.eup %6038 }
 0xb52   : > { %v4006_v29 = vpop.xlane.xlu1 %4005  ;;  %v4025_v30 = vsel %vm1521_vm2, %v6039_v28, 0.0 }
 0xb53   : > { %v4014_v32 = vsub.f32 %v3998_v15, %v4006_v29  ;;  %4026 = vadd.xlane.f32.xlu0 %v4025_v30 }
 0xb55   : > { %v4019_v33 = vmul.f32 1.442695, %v4014_v32 }
 0xb57   : > { %6042 = vpow2.f32 %v4019_v33  ;;  %v5130_v33 = vld [vmem:[%s7148_s11 + $0x20] sm:$0xff] }
 0xb59   : > { %v6041_v34 = vpop.eup %6040 }
 0xb5a   : > { %v4012_v35 = vpop.xlane.xlu1 %4011  ;;  %v4031_v36 = vsel %vm1521_vm2, %v6041_v34, 0.0 }
 0xb5b   : > { %v4016_v37 = vsub.f32 %v4000_v20, %v4012_v35  ;;  %4032 = vadd.xlane.f32.xlu0 %v4031_v36  ;;  %v5133_v36 = vld [vmem:[%s7148_s11 + $0x38] sm:$0xff] }
 0xb5d   : > { %v4023_v38 = vmul.f32 1.442695, %v4016_v37 }
 0xb5f   : > { %6044 = vpow2.f32 %v4023_v38  ;;  %v5137_v38 = vld [vmem:[%s7150_s13 + $0x40] sm:$0xff] }
 0xb61   : > { %v6043_v39 = vpop.eup %6042 }
 0xb62   : > { %v4028_v40 = vsel %vm1521_vm2, %v6043_v39, 0.0 }
 0xb63   : > { %4029 = vadd.xlane.f32.xlu1 %v4028_v40  ;;  %v5139_v40 = vld [vmem:[%s7150_s13 + $0x50] sm:$0xff] }
 0xb69   : > { %v6045_v41 = vpop.eup %6044 }
 0xb6a   : > { %v4034_v42 = vsel %vm1521_vm2, %v6045_v41, 0.0 }
 0xb6b   : > { %4035 = vadd.xlane.f32.xlu1 %v4034_v42  ;;  %v5140_v42 = vld [vmem:[%s7150_s13 + $0x58] sm:$0xff] }
 0xbe0   : > { %v4027_v43 = vpop.xlane.xlu0 %4026 }
 0xbe1   : > { %6046 = vrcp.f32 %v4027_v43  ;;  %v5968_v43 = vpack.c.bf16 %v5140_v42, %v5139_v40 }
 0xbe8   : > { %v4033_v44 = vpop.xlane.xlu0 %4032 }
 0xbe9   : > { %6048 = vrcp.f32 %v4033_v44  ;;  %v5141_v44 = vld [vmem:[%s7150_s13 + $0x60] sm:$0xff] }
 0xbeb   : > { %v6047_v46 = vpop.eup %6046 }
 0xbec   : > { %v4041_v47 = vmul.f32 %v6047_v46, %v6039_v28  ;;  %v5971_v46 = vpack.c.bf16 %v5142_v45, %v5141_v44 }
 0xbee   : > { %5729 = vmatmul.mubr.msk.f32.vlgmr.msra.gmra.mrb[44].mxu0 %vm1521_vm2, %v4041_v47 }
 0xbef   : > { %5737 = vmatpush3.msra.mxu0 %v3620_v48  ;;  %5738 = vmatprep.mubr.msk.f32.mxu0 %vm6123_vm0, %v6124_v11 }
 0xbf0   : > { %v4030_v49 = vpop.xlane.xlu1 %4029  ;;  %5746 = vmatprep.subr.mxu0 %v6124_v11 }
 0xbf1   : > { %6050 = vrcp.f32 %v4030_v49 }
 0xbf3   : > { %v6049_v50 = vpop.eup %6048 }
 0xbf4   : > { %v4043_v51 = vmul.f32 %v6049_v50, %v6041_v34  ;;  %v5131_v34 = vld [vmem:[%s7148_s11 + $0x28] sm:$0xff] }
 0xbf5   : > { %v5959_v35 = vpack.c.bf16 %v5131_v34, %v5130_v33 }
 0xbf6   : > { %5739 = vmatmul.mubr.msk.f32.vlgmr.msra.gmra.mrb[46].mxu0 %vm1521_vm2, %v4043_v51  ;;  %v5128_v51 = vld [vmem:[%s7146_s9 + $0x1] ss:$0 sm:$0xff] }
 0xbf7   : > { %5748 = vmatprep.mubr.msk.f32.mxu0 %vm6123_vm0, %v6124_v11  ;;  %5747 = vmatpush3.msra.mxu0 %v5116_v59 }
 0xbf8   : > { %v4036_v52 = vpop.xlane.xlu1 %4035  ;;  %5756 = vmatprep.subr.mxu0 %v6124_v11 }
 0xbf9   : > { %6052 = vrcp.f32 %v4036_v52 }
 0xbfb   : > { %v6051_v54 = vpop.eup %6050 }
 0xbfc   : > { %v4042_v55 = vmul.f32 %v6051_v54, %v6043_v39  ;;  %v5138_v39 = vld [vmem:[%s7150_s13 + $0x48] sm:$0xff] }
 0xbfe   : > { %5734 = vmatmul.mubr.msk.f32.vlgmr.msra.gmra.mrb[40].mxu1 %vm1521_vm2, %v4042_v55 }
 0xbff   : > { %5742 = vmatpush3.msra.mxu1 %v3690_v56  ;;  %5743 = vmatprep.mubr.msk.f32.mxu1 %vm6123_vm0, %v6124_v11  ;;  %v5144_v56 = vld [vmem:[%s7150_s13 + $0x78] sm:$0xff] }
 0xc00   : > { %5751 = vmatprep.subr.mxu1 %v6124_v11 }
 0xc03   : > { %v6053_v57 = vpop.eup %6052 }
 0xc04   : > { %v4044_v58 = vmul.f32 %v6053_v57, %v6045_v41  ;;  %v5965_v41 = vpack.c.bf16 %v5138_v39, %v5137_v38 }
 0xc06   : > { %5744 = vmatmul.mubr.msk.f32.vlgmr.msra.gmra.mrb[42].mxu1 %vm1521_vm2, %v4044_v58  ;;  %v5135_v58 = vld [vmem:[%s7149_s12 + $0x1] ss:$0 sm:$0xff] }
 0xc07   : > { %5753 = vmatprep.mubr.msk.f32.mxu1 %vm6123_vm0, %v6124_v11  ;;  %5752 = vmatpush3.msra.mxu1 %v5117_v60 }
 0xc08   : > { %5761 = vmatprep.subr.mxu1 %v6124_v11 }
 0xcc1   : > { %v4114_v62 = vpop.f32.mrb[44].mxu0 }
 0xcc2   : > { %v5730_v63 = vpop.f32.mrb[45].mxu0  ;;  %5749 = vmatmul.mubr.msk.f32.vlgmr.msra.gmra.mrb[48].mxu0 %vm1521_vm2, %v4114_v62 }
 0xcc3   : > { %5757 = vmatpush3.msra.mxu0 %v5118_v61  ;;  %5758 = vmatprep.mubr.msk.f32.mxu0 %vm6123_vm0, %v6124_v11  ;;  %v5146_v63 = vld [vmem:[%s7151_s14 + $0x1] ss:$0 sm:$0xff] }
 0xcc4   : > { %5958 = vmatprep.subr.bf16.mxu0 %v6122_v3 }
 0xcc9   : > { %v4260_v0 = vpop.f32.mrb[46].mxu0 }
 0xcca   : > { %v5740_v1 = vpop.f32.mrb[47].mxu0  ;;  %5759 = vmatmul.mubr.msk.f32.vlgmr.msra.gmra.mrb[50].mxu0 %vm1521_vm2, %v4260_v0 }
 0xccb   : > { %5774 = vmatprep.mubr.msk.f32.mxu0 %vm6123_vm0, %v6124_v11  ;;  %5960 = vmatpush3.bf16.msra.mxu0 %v5959_v35 }
 0xccc   : > { %5961 = vmatprep.subr.bf16.mxu0 %v6122_v3 }
 0xcd1   : > { %v4187_v4 = vpop.f32.mrb[40].mxu1 }
 0xcd2   : > { %v5735_v5 = vpop.f32.mrb[41].mxu1  ;;  %5754 = vmatmul.mubr.msk.f32.vlgmr.msra.gmra.mrb[44].mxu1 %vm1521_vm2, %v4187_v4 }
 0xcd3   : > { %5762 = vmatpush3.msra.mxu1 %v5119_v2  ;;  %5763 = vmatprep.mubr.msk.f32.mxu1 %vm6123_vm0, %v6124_v11 }
 0xcd4   : > { %5964 = vmatprep.subr.bf16.mxu1 %v6122_v3 }
 0xcd9   : > { %v4333_v6 = vpop.f32.mrb[42].mxu1 }
 0xcda   : > { %v5745_v7 = vpop.f32.mrb[43].mxu1  ;;  %5764 = vmatmul.mubr.msk.f32.vlgmr.msra.gmra.mrb[46].mxu1 %vm1521_vm2, %v4333_v6 }
 0xcdb   : > { %5793 = vmatprep.mubr.msk.f32.mxu1 %vm6123_vm0, %v6124_v11  ;;  %v5125_v11 = vld [vmem:[%s7145_s8 + $0x1] ss:$0 sm:$0xff]  ;;  %5966 = vmatpush3.bf16.msra.mxu1 %v5965_v41 }
 0xcdc   : > { %5967 = vmatprep.subr.bf16.mxu1 %v6122_v3 }
 0xcdf   : > { %5969 = vmatpush3.bf16.msra.mxu1 %v5968_v43 }
 0xce0   : > { %5970 = vmatprep.subr.bf16.mxu1 %v6122_v3 }
 0xce3   : > { %5972 = vmatpush3.bf16.msra.mxu1 %v5971_v46 }
 0xce4   : > { %5973 = vmatprep.subr.bf16.mxu1 %v6122_v3  ;;  %v5143_v3 = vld [vmem:[%s7150_s13 + $0x70] sm:$0xff] }
 0xce5   : > { %v5974_v57 = vpack.c.bf16 %v5144_v56, %v5143_v3 }
 0xce7   : > { %5975 = vmatpush3.bf16.msra.mxu1 %v5974_v57 }
 0xd95   : > { %v4411_v8 = vpop.f32.mrb[48].mxu0 }
 0xd96   : > { %v5750_v9 = vpop.f32.mrb[49].mxu0  ;;  %v4634_v14 = vsel %vm589_vm1, %v4411_v8, 0.0 }
 0xd9d   : > { %v4557_v10 = vpop.f32.mrb[50].mxu0 }
 0xd9e   : > { %v5760_v12 = vpop.f32.mrb[51].mxu0  ;;  %v4637_v19 = vsel %vm589_vm1, %v4557_v10, 0.0 }
 0xda5   : > { %v4484_v13 = vpop.f32.mrb[44].mxu1 }
 0xda6   : > { %v4635_v15 = vsel %vm589_vm1, %v4484_v13, 0.0  ;;  %v5755_v16 = vpop.f32.mrb[45].mxu1 }
 0xda7   : > { %v4636_v17 = vadd.f32 %v4635_v15, %v4634_v14  ;;  %v5150_v16 = vld [vmem:[%s7152_s15 + $0x1] ss:$0 sm:$0xff] }
 0xda9   : > { %v4638_v20 = vadd.f32 %v4637_v19, %v4636_v17  ;;  %v5151_v19 = vld [vmem:[%s7153_s16 + $0x1] ss:$0 sm:$0xff] }
 0xdad   : > { %v4630_v21 = vpop.f32.mrb[46].mxu1 }
 0xdae   : > { %v4639_v22 = vsel %vm589_vm1, %v4630_v21, 0.0  ;;  %v5765_v23 = vpop.f32.mrb[47].mxu1 }
 0xdaf   : > { %v4640_v24 = vadd.f32 %v4639_v22, %v4638_v20 }
 0xdb1   : > { %v4649_v25 = vadd.f32 %v5125_v11, %v4640_v24 }
 0xdb3   : > { %v4650_v26 = vadd.f32 %v4649_v25, %v6728_v31  ;;  %v5132_v31 = vld [vmem:[%s7148_s11 + $0x30] sm:$0xff] }
 0xdb4   : > { %v5962_v37 = vpack.c.bf16 %v5133_v36, %v5132_v31 }
 0xdb5   : > { %v4655_v18 = vsel %vm589_vm1, %v4650_v26, 0.0 }
 0xdb6   : > { %4656 = vadd.xlane.f32.xlu0 %v4655_v18  ;;  %5963 = vmatpush3.bf16.msra.mxu0 %v5962_v37 }
 0xe43   : > { %v4657_v27 = vpop.xlane.xlu0 %4656 }
 0xe44   : > { %v4658_v28 = vmul.f32 0.03125, %v4657_v27 }
 0xe46   : > { %v4659_v29 = vsub.f32 %v4650_v26, %v4658_v28 }
 0xe48   : > { %v4660_v30 = vmul.f32 %v4659_v29, %v4659_v29 }
 0xe4a   : > { %v4661_v32 = vsel %vm589_vm1, %v4660_v30, 0.0 }
 0xe4b   : > { %4662 = vadd.xlane.f32.xlu1 %v4661_v32 }
 0xed8   : > { %v4663_v47 = vpop.xlane.xlu1 %4662 }
 0xed9   : > { %v4664_v48 = vmul.f32 0.03125, %v4663_v47 }
 0xedb   : > { %v4665_v49 = vadd.f32 1e-05, %v4664_v48 }
 0xedd   : > { %6054 = vrsqrt.f32 %v4665_v49 }
 0xee7   : > { %v6055_v50 = vpop.eup %6054 }
 0xee8   : > { %v4667_v52 = vmul.f32 %v6055_v50, %v4659_v29 }
 0xeea   : > { %v4674_v54 = vmul.f32 %v5128_v51, %v4667_v52 }
 0xeec   : > { %v4681_v55 = vadd.f32 %v5129_v53, %v4674_v54 }
 0xeee   : > { %5775 = vmatmul.mubr.msk.f32.vlgmr.msra.gmra.mrb[52].mxu0 %vm589_vm1, %v4681_v55 }
 0xfc1   : > { %v4764_v59 = vpop.f32.mrb[52].mxu0 }
 0xfc2   : > { %v4765_v60 = vadd.f32 %v5135_v58, %v4764_v59  ;;  %v5776_v61 = vpop.f32.mrb[53].mxu0 }
 0xfc4   : > { %v4768_v62 = vmax.f32 %v4765_v60, 0.0 }
 0xfc6   : > { %5794 = vmatmul.mubr.msk.f32.vlgmr.msra.gmra.mrb[48].mxu1 %vm2608_vm3, %v4768_v62 }
0x1099   : > { %v4855_v0 = vpop.f32.mrb[48].mxu1 }
0x109a   : > { %v4856_v1 = vadd.f32 %v5146_v63, %v4855_v0  ;;  %v5795_v2 = vpop.f32.mrb[49].mxu1 }
0x109c   : > { %v4859_v4 = vadd.f32 %v4856_v1, %v4681_v55 }
0x109e   : > { %v4864_v5 = vsel %vm589_vm1, %v4859_v4, 0.0 }
0x109f   : > { %4865 = vadd.xlane.f32.xlu0 %v4864_v5 }
0x112c   : > { %v4866_v6 = vpop.xlane.xlu0 %4865 }
0x112d   : > { %v4867_v7 = vmul.f32 0.03125, %v4866_v6 }
0x112f   : > { %v4868_v8 = vsub.f32 %v4859_v4, %v4867_v7 }
0x1131   : > { %v4869_v9 = vmul.f32 %v4868_v8, %v4868_v8 }
0x1133   : > { %v4870_v10 = vsel %vm589_vm1, %v4869_v9, 0.0 }
0x1134   : > { %4871 = vadd.xlane.f32.xlu1 %v4870_v10 }
0x11c1   : > { %v4872_v12 = vpop.xlane.xlu1 %4871 }
0x11c2   : > { %v4873_v13 = vmul.f32 0.03125, %v4872_v12 }
0x11c4   : > { %v4874_v14 = vadd.f32 1e-05, %v4873_v13 }
0x11c6   : > { %6056 = vrsqrt.f32 %v4874_v14 }
0x11d0   : > { %v6057_v15 = vpop.eup %6056 }
0x11d1   : > { %v4876_v17 = vmul.f32 %v6057_v15, %v4868_v8 }
0x11d3   : > { %v4883_v20 = vmul.f32 %v5150_v16, %v4876_v17 }
0x11d5   : > { %v4890_v21 = vadd.f32 %v5151_v19, %v4883_v20 }
0x11d7   : > { %4891 = vst.msk [vmem:[%s539_s26] sm:$0xff] %vm589_vm1, %v4890_v21 }
0x11d8   : > { %6071 = shalt.err (!%p6068_p3)
}
0x11d9   : > { %s6072_s27 = scalar_lea.hbm %s7094_s2, 128  ;;  %s6076_s26 = scalar_lea.hbm %s7182_s17, 256 }
0x11da   : > { %p6073_p4 = scmp.ne.s32.totalorder %s7094_s2, %s6072_s27  ;;  %p6077_p9 = scmp.lt.u32.totalorder %s7094_s2, %s7182_s17 }
0x11db   : > { %p6078_p10 = scmp.lt.u32.totalorder %s6076_s26, %s6072_s27  ;;  %p6080_p12 = scmp.lt.u32.totalorder %s6072_s27, %s7094_s2 }
0x11dc   : > { %p6074_p7 = pnand %p6073_p4, %p6254_p5 }
0x11dd   : > { %p6079_p11 = por %p6078_p10, %p6077_p9 }
0x11de   : > { %p6075_p8 = pneg %p6074_p7 }
0x11df   : > { %p6081_p13 = por %p6080_p12, %p6079_p11 }
0x11e1   : > { %p6082_p0 = pnand %p6081_p13, %p6075_p8 }
0x11e3   : > { %6085 = shalt.err (!%p6082_p0)
}
0x11e4   : > { %5976 = dma.vmem_to_hbm [thread:$0]  (%p6254_p5), %s7096_s21, 128, %s7094_s2, %s4893_s29  }
0x11e5 PF: > { %s7183_s30 = sld [smem:[#allocation7_spill]]  ;;  %s7184_s28 = sld [smem:[#allocation5_spill]] }
0x11eb   : > { %p5982_p1 = scmp.ge.s32.totalorder %s7183_s30, 2  ;;  %s4918_s19 = sand.u32 1, %s7184_s28  }
0x11ec   : > { %s4919_s18 = scalar_lea.sflag [#allocation3], %s4918_s19 }
0x11ed   : > { %p5979_p2 = pnand %p5982_p1, %p6258_p6 }
0x11ef   : > { %6103 = dma.done.wait (!%p5979_p2), %s4919_s18, 128  }
0x11f0   : > { %6105 = vsyncadd (!%p5979_p2), %s4919_s18, 4294967168  ;;  %s7186_s27 = sld [smem:[#allocation8_spill]]  ;;  %s7187_s0 = sld [smem:[#allocation6_spill]] }
0x11f1   : > { %s7188_s26 = sld [smem:[#allocation9_spill]]  ;;  %s7189_s24 = smov %s6112_s25 }
0x11f6   : > { %p27_p3 = scmp.ge.s32.totalorder %s7186_s27, 4   ;;  %s7190_s25 = smov %s7187_s0 }
0x11f8   :  { %29 = sbr.rel (!%p27_p3) target bundleno = 8 (0x8), region = 139 }
0x11ff   :  { %4924 = vsyncpa [#allocation3], 1 }
0x1200   :  { %4926 = vsyncpa [#allocation3 + $0x1], 1 }

</bundles_post_ra>
